<compile_context>
chip_gen: v5e
topology: v5e:2x2
jax: 0.10.0
libtpu: 0.0.40
codegen_flags: <defaults>
</compile_context>

<pallas_src>
import jax
import jax.numpy as jnp
from jax import lax
from jax.experimental import pallas as pl
from jax.experimental.pallas import tpu as pltpu

INPUT_SIZE = 112
PADDED_INPUT = 128          # lane-dense input width (zero-padded)
HIDDEN_SIZE = 256
HALF = HIDDEN_SIZE // 2
BN_EPS = 1e-5


def encoder_kernel(x_ref,
                   w1_ref, t1_ref,
                   w2_ref, t2_ref,
                   w3_ref, t3_ref,
                   w4_ref, t4_ref,
                   out_ref):
    """Fused 4-layer MLP (BN+bias folded into W / shift) + LeakyReLU + L2-norm."""

    def lrelu(h):
        return jnp.where(h > 0, h, 0.1 * h)

    x = x_ref[...]  # bf16 (tile_b, 128)

    # fc1 (+bias, +bn1 folded) + LeakyReLU   (dropout = identity in eval mode)
    h = jnp.dot(x, w1_ref[...], preferred_element_type=jnp.float32) + t1_ref[...]
    h = lrelu(h)

    # fc2 (+bn2) + LeakyReLU
    h = jnp.dot(h.astype(jnp.bfloat16), w2_ref[...],
                preferred_element_type=jnp.float32) + t2_ref[...]
    h = lrelu(h)

    # fc3 (+bn3) + LeakyReLU
    h = jnp.dot(h.astype(jnp.bfloat16), w3_ref[...],
                preferred_element_type=jnp.float32) + t3_ref[...]
    h = lrelu(h)

    # fc4 (+bn4), no activation
    h = jnp.dot(h.astype(jnp.bfloat16), w4_ref[...],
                preferred_element_type=jnp.float32) + t4_ref[...]

    # F.normalize(h, p=2, dim=1) == h / max(||h||, 1e-12) == h * rsqrt(max(ss, 1e-24))
    ss = jnp.sum(h * h, axis=1, keepdims=True)            # XLU lane reduction (f32)
    out_ref[...] = h * lax.rsqrt(jnp.maximum(ss, 1e-24))  # EUP rsqrt, f32 output


def make_params(key):
    """Deterministic init of Linear + BatchNorm1d (running stats), then fold
    BN scale and the linear bias into bf16 weights + a single f32 shift/layer."""
    ks = jax.random.split(key, 16)
    dims = [(INPUT_SIZE, HIDDEN_SIZE),
            (HIDDEN_SIZE, HIDDEN_SIZE),
            (HIDDEN_SIZE, HALF),
            (HALF, HALF)]
    params = {}
    for li, (din, dout) in enumerate(dims, start=1):
        k0, k1, k2, k3 = jax.random.split(ks[li - 1], 4)
        w = jax.random.normal(k0, (din, dout), jnp.float32) * 0.05
        b = jax.random.normal(k1, (1, dout), jnp.float32) * 0.02
        gamma = 1.0 + 0.1 * jax.random.normal(k2, (1, dout), jnp.float32)
        beta = 0.05 * jax.random.normal(k3, (1, dout), jnp.float32)
        rmean = 0.01 * jax.random.normal(ks[8 + li - 1], (1, dout), jnp.float32)
        rvar = 1.0 + 0.1 * jax.random.uniform(ks[12 + li - 1], (1, dout), jnp.float32)

        # BN(inference):  y = (h - rmean) * gamma / sqrt(rvar + eps) + beta = h*s + t
        scale = gamma / jnp.sqrt(rvar + BN_EPS)            # (1, dout)
        shift = b * scale + (beta - rmean * scale)         # bias folded in too
        w_fold = w * scale                                 # scale output columns

        if li == 1:
            # zero-pad W1 rows 112 -> 128 so the padded-x matmul is unchanged
            w_fold = jnp.pad(w_fold, ((0, PADDED_INPUT - INPUT_SIZE), (0, 0)))

        params[f"w{li}"] = w_fold.astype(jnp.bfloat16)     # bf16 for the MXU
        params[f"t{li}"] = shift                           # f32 shift
    return params


def encoder_forward(x, params, tile_b=128):
    """x: (B, INPUT_SIZE) f32  ->  (B, HALF) f32 (unit-norm rows)."""
    B = x.shape[0]
    # pad batch to a multiple of tile_b and features 112 -> 128 (zeros)
    Bp = ((B + tile_b - 1) // tile_b) * tile_b
    xp = jnp.pad(x, ((0, Bp - B), (0, PADDED_INPUT - INPUT_SIZE))).astype(jnp.bfloat16)
    grid = (Bp // tile_b,)

    def rep_spec(shape):
        # replicated weight/shift: same full block every grid step
        return pl.BlockSpec(shape, lambda i: (0, 0))

    in_specs = [pl.BlockSpec((tile_b, PADDED_INPUT), lambda i: (i, 0))]
    args = [xp]
    for li in range(1, 5):
        for name in ("w", "t"):
            arr = params[f"{name}{li}"]
            in_specs.append(rep_spec(arr.shape))
            args.append(arr)

    out = pl.pallas_call(
        encoder_kernel,
        out_shape=jax.ShapeDtypeStruct((Bp, HALF), jnp.float32),
        grid_spec=pltpu.PrefetchScalarGridSpec(
            num_scalar_prefetch=0,
            grid=grid,
            in_specs=in_specs,
            out_specs=pl.BlockSpec((tile_b, HALF), lambda i: (i, 0)),
        ),
        compiler_params=pltpu.CompilerParams(
            dimension_semantics=("parallel",)),
    )(*args)
    return out[:B]


def siamese_forward(anchor, positive, negative, params):
    """Shared-weight encoder applied to the three inputs (stacked along batch)."""
    # TODO(synk): at production batch sizes, feed the three arrays via a leading
    # grid axis instead of materializing this concat in HBM.
    B = anchor.shape[0]
    stacked = jnp.concatenate([anchor, positive, negative], axis=0)
    enc = encoder_forward(stacked, params)
    return enc[:B], enc[B:2 * B], enc[2 * B:]


if __name__ == "__main__":
    key = jax.random.PRNGKey(0)
    k_par, k_a, k_p, k_n = jax.random.split(key, 4)

    params = make_params(k_par)

    batch = 8
    anchor = jax.random.normal(k_a, (batch, INPUT_SIZE), jnp.float32)
    positive = jax.random.normal(k_p, (batch, INPUT_SIZE), jnp.float32)
    negative = jax.random.normal(k_n, (batch, INPUT_SIZE), jnp.float32)

    a_out, p_out, n_out = siamese_forward(anchor, positive, negative, params)
    jax.block_until_ready((a_out, p_out, n_out))

    # sanity: outputs are unit-norm rows of shape (batch, HIDDEN_SIZE // 2)
    assert a_out.shape == (batch, HALF)
    assert p_out.shape == (batch, HALF)
    assert n_out.shape == (batch, HALF)
    for o in (a_out, p_out, n_out):
        norms = jnp.linalg.norm(o, axis=1)
        assert jnp.allclose(norms, 1.0, atol=1e-4), norms

    print("KERNEL_OK")
</pallas_src>

<mosaic_0001>
module attributes {stable_mosaic.version = 11 : i64} {
  func.func @encoder_kernel(%arg0: i32, %arg1: memref<128x128xbf16, #tpu.memory_space<vmem>>, %arg2: memref<128x256xbf16, #tpu.memory_space<vmem>>, %arg3: memref<1x256xf32, #tpu.memory_space<vmem>>, %arg4: memref<256x256xbf16, #tpu.memory_space<vmem>>, %arg5: memref<1x256xf32, #tpu.memory_space<vmem>>, %arg6: memref<256x128xbf16, #tpu.memory_space<vmem>>, %arg7: memref<1x128xf32, #tpu.memory_space<vmem>>, %arg8: memref<128x128xbf16, #tpu.memory_space<vmem>>, %arg9: memref<1x128xf32, #tpu.memory_space<vmem>>, %arg10: memref<128x128xf32, #tpu.memory_space<vmem>>) attributes {dimension_semantics = [#tpu.dimension_semantics<parallel>], iteration_bounds = array<i64: 1>, scalar_prefetch = 0 : i64, scratch_operands = 0 : i64, tpu.core_type = #tpu.core_type<tc>, window_params = [{transform_indices = @transform_0, window_bounds = array<i64: 128, 128>}, {pipeline_mode = #tpu.pipeline_mode<synchronous>, transform_indices = @transform_1, window_bounds = array<i64: 128, 256>}, {pipeline_mode = #tpu.pipeline_mode<synchronous>, transform_indices = @transform_2, window_bounds = array<i64: 1, 256>}, {pipeline_mode = #tpu.pipeline_mode<synchronous>, transform_indices = @transform_3, window_bounds = array<i64: 256, 256>}, {pipeline_mode = #tpu.pipeline_mode<synchronous>, transform_indices = @transform_4, window_bounds = array<i64: 1, 256>}, {pipeline_mode = #tpu.pipeline_mode<synchronous>, transform_indices = @transform_5, window_bounds = array<i64: 256, 128>}, {pipeline_mode = #tpu.pipeline_mode<synchronous>, transform_indices = @transform_6, window_bounds = array<i64: 1, 128>}, {pipeline_mode = #tpu.pipeline_mode<synchronous>, transform_indices = @transform_7, window_bounds = array<i64: 128, 128>}, {pipeline_mode = #tpu.pipeline_mode<synchronous>, transform_indices = @transform_8, window_bounds = array<i64: 1, 128>}, {transform_indices = @transform_9, window_bounds = array<i64: 128, 128>}]} {
    %c0 = arith.constant 0 : index
    %c0_0 = arith.constant 0 : index
    %0 = vector.load %arg1[%c0, %c0_0] : memref<128x128xbf16, #tpu.memory_space<vmem>>, vector<128x128xbf16>
    %c0_1 = arith.constant 0 : index
    %c0_2 = arith.constant 0 : index
    %1 = vector.load %arg2[%c0_1, %c0_2] : memref<128x256xbf16, #tpu.memory_space<vmem>>, vector<128x256xbf16>
    %cst = arith.constant dense<0.000000e+00> : vector<128x256xf32>
    %2 = tpu.matmul %0, %1, %cst {dimension_numbers = #tpu.dot_dimension_numbers<[1], [0], [0], [1], [0, 0, 1, 1], [], []>} : vector<128x128xbf16>, vector<128x256xbf16>, vector<128x256xf32> -> vector<128x256xf32>
    %c0_3 = arith.constant 0 : index
    %c0_4 = arith.constant 0 : index
    %3 = vector.load %arg3[%c0_3, %c0_4] : memref<1x256xf32, #tpu.memory_space<vmem>>, vector<1x256xf32>
    %4 = vector.broadcast %3 : vector<1x256xf32> to vector<128x256xf32>
    %5 = arith.addf %2, %4 : vector<128x256xf32>
    %cst_5 = arith.constant 0.000000e+00 : f32
    %6 = vector.broadcast %cst_5 : f32 to vector<128x256xf32>
    %7 = arith.cmpf ogt, %5, %6 : vector<128x256xf32>
    %cst_6 = arith.constant 1.000000e-01 : f32
    %8 = vector.broadcast %cst_6 : f32 to vector<128x256xf32>
    %9 = arith.mulf %8, %5 : vector<128x256xf32>
    %10 = arith.select %7, %5, %9 : vector<128x256xi1>, vector<128x256xf32>
    %11 = arith.truncf %10 : vector<128x256xf32> to vector<128x256xbf16>
    %c0_7 = arith.constant 0 : index
    %c0_8 = arith.constant 0 : index
    %12 = vector.load %arg4[%c0_7, %c0_8] : memref<256x256xbf16, #tpu.memory_space<vmem>>, vector<256x256xbf16>
    %cst_9 = arith.constant dense<0.000000e+00> : vector<128x256xf32>
    %13 = tpu.matmul %11, %12, %cst_9 {dimension_numbers = #tpu.dot_dimension_numbers<[1], [0], [0], [1], [0, 0, 1, 1], [], []>} : vector<128x256xbf16>, vector<256x256xbf16>, vector<128x256xf32> -> vector<128x256xf32>
    %c0_10 = arith.constant 0 : index
    %c0_11 = arith.constant 0 : index
    %14 = vector.load %arg5[%c0_10, %c0_11] : memref<1x256xf32, #tpu.memory_space<vmem>>, vector<1x256xf32>
    %15 = vector.broadcast %14 : vector<1x256xf32> to vector<128x256xf32>
    %16 = arith.addf %13, %15 : vector<128x256xf32>
    %cst_12 = arith.constant 0.000000e+00 : f32
    %17 = vector.broadcast %cst_12 : f32 to vector<128x256xf32>
    %18 = arith.cmpf ogt, %16, %17 : vector<128x256xf32>
    %cst_13 = arith.constant 1.000000e-01 : f32
    %19 = vector.broadcast %cst_13 : f32 to vector<128x256xf32>
    %20 = arith.mulf %19, %16 : vector<128x256xf32>
    %21 = arith.select %18, %16, %20 : vector<128x256xi1>, vector<128x256xf32>
    %22 = arith.truncf %21 : vector<128x256xf32> to vector<128x256xbf16>
    %c0_14 = arith.constant 0 : index
    %c0_15 = arith.constant 0 : index
    %23 = vector.load %arg6[%c0_14, %c0_15] : memref<256x128xbf16, #tpu.memory_space<vmem>>, vector<256x128xbf16>
    %cst_16 = arith.constant dense<0.000000e+00> : vector<128x128xf32>
    %24 = tpu.matmul %22, %23, %cst_16 {dimension_numbers = #tpu.dot_dimension_numbers<[1], [0], [0], [1], [0, 0, 1, 1], [], []>} : vector<128x256xbf16>, vector<256x128xbf16>, vector<128x128xf32> -> vector<128x128xf32>
    %c0_17 = arith.constant 0 : index
    %c0_18 = arith.constant 0 : index
    %25 = vector.load %arg7[%c0_17, %c0_18] : memref<1x128xf32, #tpu.memory_space<vmem>>, vector<1x128xf32>
    %26 = vector.broadcast %25 : vector<1x128xf32> to vector<128x128xf32>
    %27 = arith.addf %24, %26 : vector<128x128xf32>
    %cst_19 = arith.constant 0.000000e+00 : f32
    %28 = vector.broadcast %cst_19 : f32 to vector<128x128xf32>
    %29 = arith.cmpf ogt, %27, %28 : vector<128x128xf32>
    %cst_20 = arith.constant 1.000000e-01 : f32
    %30 = vector.broadcast %cst_20 : f32 to vector<128x128xf32>
    %31 = arith.mulf %30, %27 : vector<128x128xf32>
    %32 = arith.select %29, %27, %31 : vector<128x128xi1>, vector<128x128xf32>
    %33 = arith.truncf %32 : vector<128x128xf32> to vector<128x128xbf16>
    %c0_21 = arith.constant 0 : index
    %c0_22 = arith.constant 0 : index
    %34 = vector.load %arg8[%c0_21, %c0_22] : memref<128x128xbf16, #tpu.memory_space<vmem>>, vector<128x128xbf16>
    %cst_23 = arith.constant dense<0.000000e+00> : vector<128x128xf32>
    %35 = tpu.matmul %33, %34, %cst_23 {dimension_numbers = #tpu.dot_dimension_numbers<[1], [0], [0], [1], [0, 0, 1, 1], [], []>} : vector<128x128xbf16>, vector<128x128xbf16>, vector<128x128xf32> -> vector<128x128xf32>
    %c0_24 = arith.constant 0 : index
    %c0_25 = arith.constant 0 : index
    %36 = vector.load %arg9[%c0_24, %c0_25] : memref<1x128xf32, #tpu.memory_space<vmem>>, vector<1x128xf32>
    %37 = vector.broadcast %36 : vector<1x128xf32> to vector<128x128xf32>
    %38 = arith.addf %35, %37 : vector<128x128xf32>
    %39 = arith.mulf %38, %38 : vector<128x128xf32>
    %cst_26 = arith.constant dense<0.000000e+00> : vector<128xf32>
    %40 = vector.multi_reduction <add>, %39, %cst_26 [1] : vector<128x128xf32> to vector<128xf32>
    %41 = vector.shape_cast %40 : vector<128xf32> to vector<128x1xf32>
    %cst_27 = arith.constant 1.000000e-24 : f32
    %42 = vector.broadcast %cst_27 : f32 to vector<128x1xf32>
    %43 = arith.maximumf %41, %42 : vector<128x1xf32>
    %44 = math.rsqrt %43 : vector<128x1xf32>
    %45 = vector.broadcast %44 : vector<128x1xf32> to vector<128x128xf32>
    %46 = arith.mulf %38, %45 : vector<128x128xf32>
    %c0_28 = arith.constant 0 : index
    %c0_29 = arith.constant 0 : index
    %47 = vector.load %arg10[%c0_28, %c0_29] : memref<128x128xf32, #tpu.memory_space<vmem>>, vector<128x128xf32>
    tpu.vector_store %arg10[%c0_28, %c0_29], %46 {strides = array<i32>} : memref<128x128xf32, #tpu.memory_space<vmem>>, vector<128x128xf32>,
    return
  }
  func.func @transform_0(%arg0: i32) -> (i32, i32) {
    %c0_i32 = arith.constant 0 : i32
    %c0_i32_0 = arith.constant 0 : i32
    return %arg0, %c0_i32 : i32, i32
  }
  func.func @transform_1(%arg0: i32) -> (i32, i32) {
    %c0_i32 = arith.constant 0 : i32
    %c0_i32_0 = arith.constant 0 : i32
    %c0_i32_1 = arith.constant 0 : i32
    return %c0_i32, %c0_i32_0 : i32, i32
  }
  func.func @transform_2(%arg0: i32) -> (i32, i32) {
    %c0_i32 = arith.constant 0 : i32
    %c0_i32_0 = arith.constant 0 : i32
    %c0_i32_1 = arith.constant 0 : i32
    return %c0_i32, %c0_i32_0 : i32, i32
  }
  func.func @transform_3(%arg0: i32) -> (i32, i32) {
    %c0_i32 = arith.constant 0 : i32
    %c0_i32_0 = arith.constant 0 : i32
    %c0_i32_1 = arith.constant 0 : i32
    return %c0_i32, %c0_i32_0 : i32, i32
  }
  func.func @transform_4(%arg0: i32) -> (i32, i32) {
    %c0_i32 = arith.constant 0 : i32
    %c0_i32_0 = arith.constant 0 : i32
    %c0_i32_1 = arith.constant 0 : i32
    return %c0_i32, %c0_i32_0 : i32, i32
  }
  func.func @transform_5(%arg0: i32) -> (i32, i32) {
    %c0_i32 = arith.constant 0 : i32
    %c0_i32_0 = arith.constant 0 : i32
    %c0_i32_1 = arith.constant 0 : i32
    return %c0_i32, %c0_i32_0 : i32, i32
  }
  func.func @transform_6(%arg0: i32) -> (i32, i32) {
    %c0_i32 = arith.constant 0 : i32
    %c0_i32_0 = arith.constant 0 : i32
    %c0_i32_1 = arith.constant 0 : i32
    return %c0_i32, %c0_i32_0 : i32, i32
  }
  func.func @transform_7(%arg0: i32) -> (i32, i32) {
    %c0_i32 = arith.constant 0 : i32
    %c0_i32_0 = arith.constant 0 : i32
    %c0_i32_1 = arith.constant 0 : i32
    return %c0_i32, %c0_i32_0 : i32, i32
  }
  func.func @transform_8(%arg0: i32) -> (i32, i32) {
    %c0_i32 = arith.constant 0 : i32
    %c0_i32_0 = arith.constant 0 : i32
    %c0_i32_1 = arith.constant 0 : i32
    return %c0_i32, %c0_i32_0 : i32, i32
  }
  func.func @transform_9(%arg0: i32) -> (i32, i32) {
    %c0_i32 = arith.constant 0 : i32
    %c0_i32_0 = arith.constant 0 : i32
    return %arg0, %c0_i32 : i32, i32
  }
}

</mosaic_0001>

<bundles_post_ra>
// kernel: tpu_custom_call.1
= control target key start
LH: loop header
LB: loop body
LE: loop exit
PB: predicated region body
PF: predicated region fallthrough
CT: control target
= control target key end

     0   :  { %14 = vsyncpa [#allocation3], 0  ;;  %s2639_s0 = inlined_call_operand.hbm [shape: bf16[128,128], index: 0, kind: input, shape index: {}]   ;;  %s2640_s1 = inlined_call_operand.hbm [shape: bf16[128,256], index: 1, kind: input, shape index: {}]   ;;  %s2641_s2 = inlined_call_operand.hbm [shape: f32[1,256], index: 2, kind: input, shape index: {}]   ;;  %s2642_s3 = inlined_call_operand.hbm [shape: bf16[256,256], index: 3, kind: input, shape index: {}]   ;;  %s2643_s4 = inlined_call_operand.vmem [shape: f32[1,256], index: 4, kind: input, shape index: {}]   ;;  %s2644_s5 = inlined_call_operand.hbm [shape: bf16[256,128], index: 5, kind: input, shape index: {}]   ;;  %s2645_s6 = inlined_call_operand.vmem [shape: f32[1,128], index: 6, kind: input, shape index: {}]   ;;  %s2646_s7 = inlined_call_operand.hbm [shape: bf16[128,128], index: 7, kind: input, shape index: {}]   ;;  %s2647_s8 = inlined_call_operand.vmem [shape: f32[1,128], index: 8, kind: input, shape index: {}]   ;;  %s2648_s9 = inlined_call_operand.hbm [shape: f32[128,128], index: 9, kind: output, shape index: {}]  }
   0x1   :  { %15 = vsyncpa [#allocation6], 0 }
   0x2   :  { %16 = vsyncpa [#allocation9], 0 }
   0x3   :  { %17 = vsyncpa [#allocation12], 0  ;;  %s36_s11 = sshll.u32 %s2640_s1, 4  ;;  %s37_s11 = int_to_ptr.hbm [resolvable:$true] %s36_s11 }
   0x4   :  { %18 = vsyncpa [#allocation4], 0  ;;  %s2335_s12 = smov [#allocation5]   ;;  %s60_s16 = sshll.u32 %s2642_s3, 4  ;;  %s61_s16 = int_to_ptr.hbm [resolvable:$true] %s60_s16 }
   0x5   :  { %s38_s13 = sshll.u32 %s2335_s12, 4  ;;  %s2336_s17 = smov 128   ;;  %s39_s13 = int_to_ptr.vmem [resolvable:$true] %s38_s13 }
   0x6   :  { %s2337_s18 = smov 8   ;;  %s2338_s19 = smov [#allocation8]  }
   0x7   :  { %44 = dma.hbm_to_vmem [thread:$0]  %s37_s11, 2048, %s39_s13, [#allocation6], %s2336_s17, %s2336_s17, %s2337_s18  }
   0x8   :  { %s62_s20 = sshll.u32 %s2338_s19, 4  ;;  %s23_s22 = sshll.u32 %s2639_s0, 4  ;;  %s63_s20 = int_to_ptr.vmem [resolvable:$true] %s62_s20  ;;  %s24_s22 = int_to_ptr.hbm [resolvable:$true] %s23_s22 }
   0x9   :  { %68 = dma.hbm_to_vmem [thread:$0]  %s61_s16, 4096, %s63_s20, [#allocation9], %s2336_s17, %s2336_s17, %s2337_s18  }
   0xa   :  { %s2339_s3 = smov [#allocation2]   ;;  %s50_s26 = sshll.u32 %s2641_s2, 4  ;;  %s51_s26 = int_to_ptr.hbm [resolvable:$true] %s50_s26 }
   0xb   :  { %s25_s23 = sshll.u32 %s2339_s3, 4  ;;  %s2340_s27 = smov 64   ;;  %s26_s23 = int_to_ptr.vmem [resolvable:$true] %s25_s23 }
   0xc   :  { %s2341_s28 = smov 4   ;;  %s2342_s29 = smov [#allocation7]  }
   0xd   :  { %31 = dma.hbm_to_vmem [thread:$0]  %s24_s22, 1024, %s26_s23, [#allocation3], %s2340_s27, %s2340_s27, %s2341_s28  }
   0xe   :  { %s52_s30 = sshll.u32 %s2342_s29, 4  ;;  %s75_s11 = sshll.u32 %s2644_s5, 4  ;;  %s53_s30 = int_to_ptr.vmem [resolvable:$true] %s52_s30  ;;  %s76_s11 = int_to_ptr.hbm [resolvable:$true] %s75_s11 }
   0xf   :  { %55 = dma.hbm_to_vmem [thread:$0]  %s51_s26, 32, %s53_s30, [#allocation6]  }
  0x10   :  { %s90_s14 = sshll.u32 %s2646_s7, 4  ;;  %s2343_s15 = smov [#allocation10]   ;;  %s91_s14 = int_to_ptr.hbm [resolvable:$true] %s90_s14 }
  0x11   :  { %s77_s16 = sshll.u32 %s2343_s15, 4  ;;  %s2344_s2 = smov [#allocation11]   ;;  %s78_s16 = int_to_ptr.vmem [resolvable:$true] %s77_s16 }
  0x12   :  { %83 = dma.hbm_to_vmem [thread:$0]  %s76_s11, 2048, %s78_s16, [#allocation9], %s2340_s27, %s2340_s27, %s2341_s28  }
  0x13   :  { %s92_s19 = sshll.u32 %s2344_s2, 4  ;;  %s93_s19 = int_to_ptr.vmem [resolvable:$true] %s92_s19 }
  0x14   :  { %98 = dma.hbm_to_vmem [thread:$0]  %s91_s14, 1024, %s93_s19, [#allocation12], %s2340_s27, %s2340_s27, %s2341_s28  }
  0x15   :  { %2325 = dma.done.wait [#allocation3], 1024  }
  0x16   :  { %2326 = vsyncadd [#allocation3], 4294966272 }
  0x17   :  { %2327 = dma.done.wait [#allocation6], 2080  }
  0x18   :  { %2328 = vsyncadd [#allocation6], 4294965216 }
  0x19   :  { %2329 = dma.done.wait [#allocation9], 6144  }
  0x1a   :  { %2330 = vsyncadd [#allocation9], 4294961152 }
  0x1b   :  { %2331 = dma.done.wait [#allocation12], 1024  }
  0x1c   :  { %2332 = vsyncadd [#allocation12], 4294966272  ;;  %v1778_v0 = vld [vmem:[#allocation5 + $0x70] sm:$0xf]  ;;  %v2031_v1 = vld [vmem:[#allocation5 + $0x74] sm:$0xf0] }
  0x1d   :  { %v1770_v2 = vld [vmem:[#allocation5 + $0x60] sm:$0xf]  ;;  %v1779_v3 = vor.u32 %v2031_v1, %v1778_v0  ;;  %v2029_v4 = vld [vmem:[#allocation5 + $0x64] sm:$0xf0]  ;;  %v1762_v6 = vld [vmem:[#allocation5 + $0x50] sm:$0xf] }
  0x1e   :  { %v1771_v5 = vor.u32 %v2029_v4, %v1770_v2  ;;  %v2027_v7 = vld [vmem:[#allocation5 + $0x54] sm:$0xf0]  ;;  %v1754_v9 = vld [vmem:[#allocation5 + $0x40] sm:$0xf]  ;;  %v2025_v10 = vld [vmem:[#allocation5 + $0x44] sm:$0xf0] }
  0x1f   :  { %291 = vmatpush.bf16.msra.mxu0 %v1779_v3  ;;  %2088 = vmatpush.bf16.msra.mxu1 %v1779_v3  ;;  %v1763_v8 = vor.u32 %v2027_v7, %v1762_v6  ;;  %v1755_v11 = vor.u32 %v2025_v10, %v1754_v9  ;;  %v1746_v12 = vld [vmem:[#allocation5 + $0x30] sm:$0xf]  ;;  %v2023_v13 = vld [vmem:[#allocation5 + $0x34] sm:$0xf0]  ;;  %v1738_v15 = vld [vmem:[#allocation5 + $0x20] sm:$0xf] }
  0x20   :  { %2089 = vmatpush.bf16.msra.mxu2 %v1779_v3  ;;  %2090 = vmatpush.bf16.msra.mxu3 %v1779_v3  ;;  %v1747_v14 = vor.u32 %v2023_v13, %v1746_v12  ;;  %v2021_v16 = vld [vmem:[#allocation5 + $0x24] sm:$0xf0]  ;;  %v1730_v18 = vld [vmem:[#allocation5 + $0x10] sm:$0xf]  ;;  %v2019_v19 = vld [vmem:[#allocation5 + $0x14] sm:$0xf0] }
  0x21   :  { %v1739_v17 = vor.u32 %v2021_v16, %v1738_v15  ;;  %v1731_v20 = vor.u32 %v2019_v19, %v1730_v18  ;;  %v1722_v21 = vld [vmem:[#allocation5] sm:$0xf]  ;;  %v2017_v22 = vld [vmem:[#allocation5 + $0x4] sm:$0xf0]  ;;  %v2030_v23 = vld [vmem:[#allocation5 + $0x74] sm:$0xf] }
  0x22   :  { %v1780_v24 = vld [vmem:[#allocation5 + $0x78] sm:$0xf0]  ;;  %v1723_v25 = vor.u32 %v2017_v22, %v1722_v21  ;;  %v2028_v27 = vld [vmem:[#allocation5 + $0x64] sm:$0xf]  ;;  %v1772_v28 = vld [vmem:[#allocation5 + $0x68] sm:$0xf0] }
  0x23   :  { %292 = vmatpush.bf16.msra.mxu0 %v1771_v5  ;;  %2091 = vmatpush.bf16.msra.mxu1 %v1771_v5  ;;  %v1783_v26 = vor.u32 %v2030_v23, %v1780_v24  ;;  %v2008_v29 = vld [vmem:[#allocation2] sm:$0xff]  ;;  %v2010_v30 = vld [vmem:[#allocation2 + $0x10] sm:$0xff]  ;;  %v1775_v31 = vor.u32 %v2028_v27, %v1772_v28  ;;  %v1764_v33 = vld [vmem:[#allocation5 + $0x58] sm:$0xf0]  ;;  %s1672_s23 = sshll.u32 %s2648_s9, 4  ;;  %s1673_s23 = int_to_ptr.hbm [resolvable:$true] %s1672_s23 }
  0x24   :  { %2092 = vmatpush.bf16.msra.mxu2 %v1771_v5  ;;  %2093 = vmatpush.bf16.msra.mxu3 %v1771_v5  ;;  %v2026_v32 = vld [vmem:[#allocation5 + $0x54] sm:$0xf]  ;;  %v2024_v35 = vld [vmem:[#allocation5 + $0x44] sm:$0xf]  ;;  %v1756_v36 = vld [vmem:[#allocation5 + $0x48] sm:$0xf0] }
  0x25   :  { %v1767_v34 = vor.u32 %v2026_v32, %v1764_v33  ;;  %v1759_v37 = vor.u32 %v2024_v35, %v1756_v36  ;;  %v2022_v38 = vld [vmem:[#allocation5 + $0x34] sm:$0xf]  ;;  %v1748_v39 = vld [vmem:[#allocation5 + $0x38] sm:$0xf0]  ;;  %v2020_v41 = vld [vmem:[#allocation5 + $0x24] sm:$0xf] }
  0x26   :  { %v1751_v40 = vor.u32 %v2022_v38, %v1748_v39  ;;  %v1740_v42 = vld [vmem:[#allocation5 + $0x28] sm:$0xf0]  ;;  %v2011_v44 = vld [vmem:[#allocation2 + $0x18] sm:$0xff]  ;;  %v2018_v46 = vld [vmem:[#allocation5 + $0x14] sm:$0xf] }
  0x27   :  { %293 = vmatpush.bf16.msra.mxu0 %v1763_v8  ;;  %2094 = vmatpush.bf16.msra.mxu1 %v1763_v8  ;;  %v2009_v43 = vld [vmem:[#allocation2 + $0x8] sm:$0xff]  ;;  %v1743_v45 = vor.u32 %v2020_v41, %v1740_v42  ;;  %v1732_v47 = vld [vmem:[#allocation5 + $0x18] sm:$0xf0]  ;;  %v2016_v49 = vld [vmem:[#allocation5 + $0x4] sm:$0xf] }
  0x28   :  { %2095 = vmatpush.bf16.msra.mxu2 %v1763_v8  ;;  %2096 = vmatpush.bf16.msra.mxu3 %v1763_v8  ;;  %v1735_v48 = vor.u32 %v2018_v46, %v1732_v47  ;;  %v1724_v50 = vld [vmem:[#allocation5 + $0x8] sm:$0xf0]  ;;  %v2062_v51 = vld [vmem:[#allocation8 + $0xf4] sm:$0xf]  ;;  %v1908_v52 = vld [vmem:[#allocation8 + $0xf8] sm:$0xf0] }
  0x29   :  { %v1727_v53 = vor.u32 %v2016_v49, %v1724_v50  ;;  %v1911_v54 = vor.u32 %v2062_v51, %v1908_v52  ;;  %v2060_v55 = vld [vmem:[#allocation8 + $0xe4] sm:$0xf]  ;;  %v1900_v56 = vld [vmem:[#allocation8 + $0xe8] sm:$0xf0]  ;;  %v2058_v59 = vld [vmem:[#allocation8 + $0xd4] sm:$0xf] }
  0x2a   :  { %v2420_v57 = vld [vmem:[#allocation2 + $0x20] sm:$0xff]  ;;  %v1903_v58 = vor.u32 %v2060_v55, %v1900_v56  ;;  %v2423_v61 = vld [vmem:[#allocation2 + $0x28] sm:$0xff]  ;;  %v2426_v1 = vld [vmem:[#allocation2 + $0x30] sm:$0xff] }
  0x2b   :  { %294 = vmatpush.bf16.msra.mxu0 %v1755_v11  ;;  %2097 = vmatpush.bf16.msra.mxu1 %v1755_v11  ;;  %v1892_v60 = vld [vmem:[#allocation8 + $0xd8] sm:$0xf0]  ;;  %v2056_v63 = vld [vmem:[#allocation8 + $0xc4] sm:$0xf]  ;;  %v1884_v0 = vld [vmem:[#allocation8 + $0xc8] sm:$0xf0] }
  0x2c   :  { %2098 = vmatpush.bf16.msra.mxu2 %v1755_v11  ;;  %2099 = vmatpush.bf16.msra.mxu3 %v1755_v11  ;;  %v1895_v62 = vor.u32 %v2058_v59, %v1892_v60  ;;  %v1887_v2 = vor.u32 %v2056_v63, %v1884_v0  ;;  %v1842_v3 = vld [vmem:[#allocation8 + $0x70] sm:$0xf]  ;;  %v2047_v4 = vld [vmem:[#allocation8 + $0x74] sm:$0xf0]  ;;  %v2046_v5 = vld [vmem:[#allocation8 + $0x74] sm:$0xf] }
  0x2d   :  { %v1843_v6 = vor.u32 %v2047_v4, %v1842_v3  ;;  %v1844_v7 = vld [vmem:[#allocation8 + $0x78] sm:$0xf0]  ;;  %v1834_v9 = vld [vmem:[#allocation8 + $0x60] sm:$0xf]  ;;  %v2045_v10 = vld [vmem:[#allocation8 + $0x64] sm:$0xf0] }
  0x2e   :  { %v1847_v8 = vor.u32 %v2046_v5, %v1844_v7  ;;  %v2044_v11 = vld [vmem:[#allocation8 + $0x64] sm:$0xf]  ;;  %v1835_v12 = vor.u32 %v2045_v10, %v1834_v9  ;;  %v1836_v13 = vld [vmem:[#allocation8 + $0x68] sm:$0xf0]  ;;  %v1876_v15 = vld [vmem:[#allocation8 + $0xb8] sm:$0xf0] }
  0x2f   :  { %295 = vmatpush.bf16.msra.mxu0 %v1747_v14  ;;  %2100 = vmatpush.bf16.msra.mxu1 %v1747_v14  ;;  %v1839_v16 = vor.u32 %v2044_v11, %v1836_v13  ;;  %v2429_v18 = vld [vmem:[#allocation2 + $0x38] sm:$0xff]  ;;  %v1826_v19 = vld [vmem:[#allocation8 + $0x50] sm:$0xf]  ;;  %v2040_v27 = vld [vmem:[#allocation8 + $0x44] sm:$0xf] }
  0x30   :  { %2101 = vmatpush.bf16.msra.mxu2 %v1747_v14  ;;  %2102 = vmatpush.bf16.msra.mxu3 %v1747_v14  ;;  %v2054_v14 = vld [vmem:[#allocation8 + $0xb4] sm:$0xf]  ;;  %v1828_v23 = vld [vmem:[#allocation8 + $0x58] sm:$0xf0]  ;;  %v1820_v28 = vld [vmem:[#allocation8 + $0x48] sm:$0xf0] }
  0x31   :  { %v2042_v22 = vld [vmem:[#allocation8 + $0x54] sm:$0xf]  ;;  %v2039_v32 = vld [vmem:[#allocation8 + $0x34] sm:$0xf0]  ;;  %v1812_v35 = vld [vmem:[#allocation8 + $0x38] sm:$0xf0] }
  0x32   :  { %v1831_v24 = vor.u32 %v2042_v22, %v1828_v23  ;;  %v2038_v33 = vld [vmem:[#allocation8 + $0x34] sm:$0xf]  ;;  %v2037_v38 = vld [vmem:[#allocation8 + $0x24] sm:$0xf0]  ;;  %v2036_v39 = vld [vmem:[#allocation8 + $0x24] sm:$0xf] }
  0x33   :  { %296 = vmatpush.bf16.msra.mxu0 %v1739_v17  ;;  %2103 = vmatpush.bf16.msra.mxu1 %v1739_v17  ;;  %v1815_v36 = vor.u32 %v2038_v33, %v1812_v35  ;;  %v1804_v41 = vld [vmem:[#allocation8 + $0x28] sm:$0xf0]  ;;  %v1796_v47 = vld [vmem:[#allocation8 + $0x18] sm:$0xf0]  ;;  %v1786_v49 = vld [vmem:[#allocation8] sm:$0xf] }
  0x34   :  { %2104 = vmatpush.bf16.msra.mxu2 %v1739_v17  ;;  %2105 = vmatpush.bf16.msra.mxu3 %v1739_v17  ;;  %v1879_v17 = vor.u32 %v2054_v14, %v1876_v15  ;;  %v1807_v42 = vor.u32 %v2036_v39, %v1804_v41  ;;  %v2033_v50 = vld [vmem:[#allocation8 + $0x4] sm:$0xf0]  ;;  %v2032_v51 = vld [vmem:[#allocation8 + $0x4] sm:$0xf]  ;;  %v1788_v55 = vld [vmem:[#allocation8 + $0x8] sm:$0xf0] }
  0x35   :  { %v2052_v52 = vld [vmem:[#allocation8 + $0xa4] sm:$0xf]  ;;  %v2063_v59 = vld [vmem:[#allocation8 + $0xf4] sm:$0xf0]  ;;  %v2061_v63 = vld [vmem:[#allocation8 + $0xe4] sm:$0xf0] }
  0x36   :  { %v2059_v3 = vld [vmem:[#allocation8 + $0xd4] sm:$0xf0]  ;;  %v1882_v5 = vld [vmem:[#allocation8 + $0xc0] sm:$0xf]  ;;  %v2050_v7 = vld [vmem:[#allocation8 + $0x94] sm:$0xf] }
  0x37   :  { %297 = vmatpush.bf16.msra.mxu0 %v1731_v20  ;;  %2106 = vmatpush.bf16.msra.mxu1 %v1731_v20  ;;  %v157_v11 = vld [vmem:[#allocation7] sm:$0x3]  ;;  %v2055_v13 = vld [vmem:[#allocation8 + $0xb4] sm:$0xf0]  ;;  %v1858_v22 = vld [vmem:[#allocation8 + $0x90] sm:$0xf] }
  0x38   :  { %2107 = vmatpush.bf16.msra.mxu2 %v1731_v20  ;;  %2108 = vmatpush.bf16.msra.mxu3 %v1731_v20  ;;  %v2043_v20 = vld [vmem:[#allocation8 + $0x54] sm:$0xf0] }
  0x39   :  { %v1827_v21 = vor.u32 %v2043_v20, %v1826_v19  ;;  %v2053_v19 = vld [vmem:[#allocation8 + $0xa4] sm:$0xf0]  ;;  %v2051_v23 = vld [vmem:[#allocation8 + $0x94] sm:$0xf0] }
  0x3b   :  { %298 = vmatpush.bf16.msra.mxu0 %v1723_v25  ;;  %2109 = vmatpush.bf16.msra.mxu1 %v1723_v25 }
  0x3c   :  { %2110 = vmatpush.bf16.msra.mxu2 %v1723_v25  ;;  %2111 = vmatpush.bf16.msra.mxu3 %v1723_v25  ;;  %v1818_v25 = vld [vmem:[#allocation8 + $0x40] sm:$0xf] }
  0x3e   :  { %299 = vmatmul.bf16.vlgmr.msra.gmra.mxu0 %v2008_v29  ;;  %309 = vmatmul.bf16.vlgmr.msra.gmra.mxu1 %v2010_v30 }
  0x3f   :  { %340 = vmatpush.bf16.msrb.mxu1 %v1783_v26  ;;  %319 = vmatmul.bf16.vlgmr.msra.gmra.mxu2 %v2420_v57  ;;  %v2041_v26 = vld [vmem:[#allocation8 + $0x44] sm:$0xf0] }
  0x40   :  { %329 = vmatmul.bf16.vlgmr.msra.gmra.mxu3 %v2426_v1  ;;  %699 = vmatpush.bf16.msrb.mxu2 %v1843_v6  ;;  %v2057_v6 = vld [vmem:[#allocation8 + $0xc4] sm:$0xf0] }
  0x41   :  { %797 = vmatpush.bf16.msrb.mxu0 %v1847_v8  ;;  %v1860_v8 = vld [vmem:[#allocation8 + $0x98] sm:$0xf0]  ;;  %v1883_v9 = vor.u32 %v2057_v6, %v1882_v5 }
  0x42   :  { %v1863_v10 = vor.u32 %v2050_v7, %v1860_v8  ;;  %v2070_v8 = vld [vmem:[#allocation10 + $0x30] sm:$0xff] }
  0x43   :  { %341 = vmatpush.bf16.msrb.mxu1 %v1775_v31  ;;  %v1810_v31 = vld [vmem:[#allocation8 + $0x30] sm:$0xf] }
  0x44   :  { %700 = vmatpush.bf16.msrb.mxu2 %v1835_v12  ;;  %v1874_v12 = vld [vmem:[#allocation8 + $0xb0] sm:$0xf] }
  0x45   :  { %798 = vmatpush.bf16.msrb.mxu0 %v1839_v16  ;;  %v1875_v14 = vor.u32 %v2055_v13, %v1874_v12  ;;  %v2434_v16 = vperm.slane %v157_v11, 0 }
  0x47   :  { %342 = vmatpush.bf16.msrb.mxu1 %v1767_v34  ;;  %v1811_v34 = vor.u32 %v2039_v32, %v1810_v31  ;;  %v1850_v31 = vld [vmem:[#allocation8 + $0x80] sm:$0xf] }
  0x48   :  { %701 = vmatpush.bf16.msrb.mxu2 %v1827_v21 }
  0x49   :  { %799 = vmatpush.bf16.msrb.mxu0 %v1831_v24 }
  0x4b   :  { %343 = vmatpush.bf16.msrb.mxu1 %v1759_v37  ;;  %v1802_v37 = vld [vmem:[#allocation8 + $0x20] sm:$0xf] }
  0x4e   :  { %304 = vmatmul.bf16.gmra.mxu0 %v2009_v43  ;;  %314 = vmatmul.bf16.gmra.mxu1 %v2011_v44 }
  0x4f   :  { %344 = vmatpush.bf16.msrb.mxu1 %v1751_v40  ;;  %324 = vmatmul.bf16.gmra.mxu2 %v2423_v61  ;;  %v1803_v40 = vor.u32 %v2037_v38, %v1802_v37 }
  0x50   :  { %334 = vmatmul.bf16.gmra.mxu3 %v2429_v18 }
  0x53   :  { %345 = vmatpush.bf16.msrb.mxu1 %v1743_v45  ;;  %v2034_v45 = vld [vmem:[#allocation8 + $0x14] sm:$0xf] }
  0x57   :  { %346 = vmatpush.bf16.msrb.mxu1 %v1735_v48  ;;  %v1799_v48 = vor.u32 %v2034_v45, %v1796_v47 }
  0x5b   :  { %347 = vmatpush.bf16.msrb.mxu1 %v1727_v53  ;;  %v1868_v53 = vld [vmem:[#allocation8 + $0xa8] sm:$0xf0] }
  0x5c   :  { %v1871_v56 = vor.u32 %v2052_v52, %v1868_v53  ;;  %v2071_v52 = vld [vmem:[#allocation10 + $0x38] sm:$0xff] }
  0x5e   :  { %348 = vmatmul.bf16.vlgmr.msrb.gmra.mxu1 %v2008_v29  ;;  %v1819_v29 = vor.u32 %v2041_v26, %v1818_v25  ;;  %v1859_v25 = vor.u32 %v2051_v23, %v1858_v22 }
  0x5f   :  { %846 = vmatpush.bf16.msra.mxu1 %v1911_v54  ;;  %v1787_v54 = vor.u32 %v2033_v50, %v1786_v49  ;;  %v2442_v50 = vperm.slane %v157_v11, 1 }
  0x60   :  { %702 = vmatpush.bf16.msrb.mxu2 %v1819_v29  ;;  %v2048_v29 = vld [vmem:[#allocation8 + $0x84] sm:$0xf] }
  0x63   :  { %847 = vmatpush.bf16.msra.mxu1 %v1903_v58  ;;  %v1906_v58 = vld [vmem:[#allocation8 + $0xf0] sm:$0xf] }
  0x64   :  { %703 = vmatpush.bf16.msrb.mxu2 %v1811_v34  ;;  %v1907_v60 = vor.u32 %v2063_v59, %v1906_v58 }
  0x66   :  { %748 = vmatpush.bf16.msrb.mxu3 %v1907_v60 }
  0x67   :  { %848 = vmatpush.bf16.msra.mxu1 %v1895_v62  ;;  %v1898_v62 = vld [vmem:[#allocation8 + $0xe0] sm:$0xf] }
  0x68   :  { %704 = vmatpush.bf16.msrb.mxu2 %v1803_v40  ;;  %v1899_v0 = vor.u32 %v2061_v63, %v1898_v62 }
  0x6a   :  { %749 = vmatpush.bf16.msrb.mxu3 %v1899_v0 }
  0x6b   :  { %849 = vmatpush.bf16.msra.mxu1 %v1887_v2  ;;  %v1890_v2 = vld [vmem:[#allocation8 + $0xd0] sm:$0xf] }
  0x6c   :  { %v1891_v4 = vor.u32 %v2059_v3, %v1890_v2 }
  0x6e   :  { %353 = vmatmul.bf16.gmra.mxu1 %v2009_v43  ;;  %v1794_v43 = vld [vmem:[#allocation8 + $0x10] sm:$0xf]  ;;  %750 = vmatpush.bf16.msrb.mxu3 %v1891_v4 }
  0x6f   :  { %850 = vmatpush.bf16.msra.mxu1 %v1879_v17  ;;  %v1866_v17 = vld [vmem:[#allocation8 + $0xa0] sm:$0xf] }
  0x70   :  { %v1867_v21 = vor.u32 %v2053_v19, %v1866_v17 }
  0x72   :  { %751 = vmatpush.bf16.msrb.mxu3 %v1883_v9  ;;  %v2078_v9 = vld [vmem:[#allocation10 + $0x70] sm:$0xff] }
  0x73   :  { %851 = vmatpush.bf16.msra.mxu1 %v1871_v56 }
  0x76   :  { %752 = vmatpush.bf16.msrb.mxu3 %v1875_v14 }
  0x77   :  { %852 = vmatpush.bf16.msra.mxu1 %v1863_v10 }
  0x7a   :  { %753 = vmatpush.bf16.msrb.mxu3 %v1867_v21 }
  0x7e   :  { %358 = vmatmul.bf16.gmra.mxu1 %v2010_v30  ;;  %v1823_v30 = vor.u32 %v2040_v27, %v1820_v28  ;;  %754 = vmatpush.bf16.msrb.mxu3 %v1859_v25 }
  0x80   :  { %800 = vmatpush.bf16.msrb.mxu0 %v1823_v30  ;;  %v1852_v30 = vld [vmem:[#allocation8 + $0x88] sm:$0xf0] }
  0x81   :  { %v1855_v34 = vor.u32 %v2048_v29, %v1852_v30  ;;  %v2069_v29 = vld [vmem:[#allocation10 + $0x28] sm:$0xff] }
  0x82   :  { %v2077_v30 = vld [vmem:[#allocation10 + $0x68] sm:$0xff] }
  0x83   :  { %853 = vmatpush.bf16.msra.mxu1 %v1855_v34 }
  0x84   :  { %801 = vmatpush.bf16.msrb.mxu0 %v1815_v36 }
  0x88   :  { %802 = vmatpush.bf16.msrb.mxu0 %v1807_v42 }
  0x8c   :  { %803 = vmatpush.bf16.msrb.mxu0 %v1799_v48 }
  0x8e   :  { %363 = vmatmul.bf16.gmra.mxu1 %v2011_v44  ;;  %v2035_v44 = vld [vmem:[#allocation8 + $0x14] sm:$0xf0] }
  0x8f   :  { %v1795_v46 = vor.u32 %v2035_v44, %v1794_v43 }
  0x91   :  { %705 = vmatpush.bf16.msrb.mxu2 %v1795_v46 }
  0x95   :  { %706 = vmatpush.bf16.msrb.mxu2 %v1787_v54 }
  0x99   :  { %1139 = vmatpush.bf16.msra.mxu2 %v2071_v52 }
  0x9d   :  { %1140 = vmatpush.bf16.msra.mxu2 %v2070_v8 }
  0x9e   :  { %368 = vmatmul.bf16.gmra.mxu1 %v2420_v57  ;;  %v1791_v57 = vor.u32 %v2032_v51, %v1788_v55 }
  0xa0   :  { %804 = vmatpush.bf16.msrb.mxu0 %v1791_v57 }
  0xa1   :  { %1141 = vmatpush.bf16.msra.mxu2 %v2069_v29 }
  0xae   :  { %373 = vmatmul.bf16.gmra.mxu1 %v2423_v61 }
  0xbb   :  { %v300_v15 = vpop.f32.mrf.mxu0  ;;  %v310_v61 = vpop.f32.mrf.mxu1 }
  0xbc   :  { %v301_v20 = vadd.f32 %v300_v15, %v2434_v16  ;;  %v311_v53 = vadd.f32 %v310_v61, %v2434_v16 }
  0xbe   :  { %378 = vmatmul.bf16.gmra.mxu1 %v2426_v1  ;;  %v421_v24 = vmul.f32 0.1, %v301_v20  ;;  %vm389_vm0 = vcmp.gt.f32.partialorder %v301_v20, 0.0  ;;  %v2049_v1 = vld [vmem:[#allocation8 + $0x84] sm:$0xf0]  ;;  %vm397_vm6 = vcmp.gt.f32.partialorder %v311_v53, 0.0 }
  0xbf   :  { %v1851_v36 = vor.u32 %v2049_v1, %v1850_v31  ;;  %v429_v57 = vmul.f32 0.1, %v311_v53 }
  0xc0   :  { %v453_v33 = vsel %vm389_vm0, %v301_v20, %v421_v24 }
  0xc1   :  { %755 = vmatpush.bf16.msrb.mxu3 %v1851_v36  ;;  %v461_v63 = vsel %vm397_vm6, %v311_v53, %v429_v57 }
  0xc2   :  { %v320_v6 = vpop.f32.mrf.mxu2 }
  0xc3   :  { %v302_v26 = vpop.f32.mrf.mxu0  ;;  %v312_v27 = vpop.f32.mrf.mxu1 }
  0xc4   :  { %v303_v28 = vadd.f32 %v302_v26, %v2434_v16  ;;  %v313_v51 = vadd.f32 %v312_v27, %v2434_v16  ;;  %v321_v27 = vadd.f32 %v320_v6, %v2434_v16  ;;  %v2067_v6 = vld [vmem:[#allocation10 + $0x18] sm:$0xff] }
  0xc6   :  { %vm391_vm1 = vcmp.gt.f32.partialorder %v303_v28, 0.0  ;;  %v423_v32 = vmul.f32 0.1, %v303_v28  ;;  %v431_v55 = vmul.f32 0.1, %v313_v51  ;;  %vm399_vm4 = vcmp.gt.f32.partialorder %v313_v51, 0.0 }
  0xc7   :  { %vm405_vm12 = vcmp.gt.f32.partialorder %v321_v27, 0.0 }
  0xc8   :  { %v455_v35 = vsel %vm391_vm1, %v303_v28, %v423_v32  ;;  %v463_v62 = vsel %vm399_vm4, %v313_v51, %v431_v55  ;;  %v2076_v51 = vld [vmem:[#allocation10 + $0x60] sm:$0xff] }
  0xc9   :  { %v485_v37 = vpack.c.bf16 %v455_v35, %v453_v33  ;;  %v489_v3 = vpack.c.bf16 %v463_v62, %v461_v63  ;;  %v437_v33 = vmul.f32 0.1, %v321_v27 }
  0xca   :  { %v322_v17 = vpop.f32.mrf.mxu2 }
  0xcb   :  { %v305_v38 = vpop.f32.mrf.mxu0  ;;  %v315_v39 = vpop.f32.mrf.mxu1  ;;  %707 = vmatmul.bf16.vlgmr.msrb.gmra.mxu2 %v485_v37  ;;  %805 = vmatmul.bf16.vlgmr.msrb.gmra.mxu0 %v485_v37  ;;  %v323_v28 = vadd.f32 %v322_v17, %v2434_v16  ;;  %v469_v37 = vsel %vm405_vm12, %v321_v27, %v437_v33  ;;  %v2066_v27 = vld [vmem:[#allocation10 + $0x10] sm:$0xff] }
  0xcc   :  { %v306_v40 = vadd.f32 %v305_v38, %v2434_v16  ;;  %v316_v10 = vadd.f32 %v315_v39, %v2434_v16 }
  0xcd   :  { %v439_v34 = vmul.f32 0.1, %v323_v28  ;;  %vm407_vm13 = vcmp.gt.f32.partialorder %v323_v28, 0.0 }
  0xce   :  { %383 = vmatmul.bf16.gmra.mxu1 %v2429_v18  ;;  %v425_v41 = vmul.f32 0.1, %v306_v40  ;;  %vm393_vm2 = vcmp.gt.f32.partialorder %v306_v40, 0.0  ;;  %v2079_v18 = vld [vmem:[#allocation10 + $0x78] sm:$0xff]  ;;  %v433_v14 = vmul.f32 0.1, %v316_v10 }
  0xcf   :  { %1188 = vmatpush.bf16.msra.mxu3 %v2079_v18  ;;  %vm401_vm9 = vcmp.gt.f32.partialorder %v316_v10, 0.0  ;;  %v471_v38 = vsel %vm407_vm13, %v323_v28, %v439_v34 }
  0xd0   :  { %v457_v46 = vsel %vm393_vm2, %v306_v40, %v425_v41  ;;  %v465_v21 = vsel %vm401_vm9, %v316_v10, %v433_v14  ;;  %v493_v40 = vpack.c.bf16 %v471_v38, %v469_v37 }
  0xd2   :  { %v325_v31 = vpop.f32.mrf.mxu2 }
  0xd3   :  { %v307_v42 = vpop.f32.mrf.mxu0  ;;  %v317_v43 = vpop.f32.mrf.mxu1  ;;  %1189 = vmatpush.bf16.msra.mxu3 %v2078_v9 }
  0xd4   :  { %v308_v44 = vadd.f32 %v307_v42, %v2434_v16  ;;  %v318_v7 = vadd.f32 %v317_v43, %v2434_v16 }
  0xd6   :  { %v427_v45 = vmul.f32 0.1, %v308_v44  ;;  %vm395_vm3 = vcmp.gt.f32.partialorder %v308_v44, 0.0  ;;  %v435_v12 = vmul.f32 0.1, %v318_v7  ;;  %vm403_vm8 = vcmp.gt.f32.partialorder %v318_v7, 0.0 }
  0xd7   :  { %1190 = vmatpush.bf16.msra.mxu3 %v2077_v30 }
  0xd8   :  { %v459_v47 = vsel %vm395_vm3, %v308_v44, %v427_v45  ;;  %v467_v20 = vsel %vm403_vm8, %v318_v7, %v435_v12  ;;  %v2075_v7 = vld [vmem:[#allocation10 + $0x58] sm:$0xff] }
  0xd9   :  { %v487_v48 = vpack.c.bf16 %v459_v47, %v457_v46  ;;  %v491_v24 = vpack.c.bf16 %v467_v20, %v465_v21  ;;  %v330_v46 = vpop.f32.mrf.mxu3  ;;  %v326_v47 = vadd.f32 %v325_v31, %v2434_v16  ;;  %v2074_v31 = vld [vmem:[#allocation10 + $0x50] sm:$0xff] }
  0xda   :  { %v327_v44 = vpop.f32.mrf.mxu2 }
  0xdb   :  { %v349_v49 = vpop.f32.mrf.mxu1  ;;  %712 = vmatmul.bf16.gmra.mxu2 %v487_v48  ;;  %810 = vmatmul.bf16.gmra.mxu0 %v487_v48  ;;  %v328_v48 = vadd.f32 %v327_v44, %v2434_v16  ;;  %v441_v18 = vmul.f32 0.1, %v326_v47  ;;  %vm409_vm0 = vcmp.gt.f32.partialorder %v326_v47, 0.0 }
  0xdc   :  { %v350_v54 = vadd.f32 %v349_v49, %v2442_v50  ;;  %v2068_v49 = vld [vmem:[#allocation10 + $0x20] sm:$0xff]  ;;  %1191 = vmatpush.bf16.msra.mxu3 %v2076_v51 }
  0xdd   :  { %v443_v53 = vmul.f32 0.1, %v328_v48  ;;  %1142 = vmatpush.bf16.msra.mxu2 %v2068_v49  ;;  %vm411_vm1 = vcmp.gt.f32.partialorder %v328_v48, 0.0  ;;  %v473_v57 = vsel %vm409_vm0, %v326_v47, %v441_v18 }
  0xde   :  { %v422_v58 = vmul.f32 0.1, %v350_v54  ;;  %vm390_vm5 = vcmp.gt.f32.partialorder %v350_v54, 0.0 }
  0xe0   :  { %v454_v0 = vsel %vm390_vm5, %v350_v54, %v422_v58  ;;  %v475_v58 = vsel %vm411_vm1, %v328_v48, %v443_v53  ;;  %1192 = vmatpush.bf16.msra.mxu3 %v2075_v7 }
  0xe1   :  { %v495_v62 = vpack.c.bf16 %v475_v58, %v473_v57  ;;  %1143 = vmatpush.bf16.msra.mxu2 %v2067_v6  ;;  %v2064_v57 = vld [vmem:[#allocation10] sm:$0xff]  ;;  %v533_v6 = vld [vmem:[%s2643_s4] sm:$0x3] }
  0xe3   :  { %v351_v56 = vpop.f32.mrf.mxu1 }
  0xe4   :  { %v352_v59 = vadd.f32 %v351_v56, %v2442_v50  ;;  %1193 = vmatpush.bf16.msra.mxu3 %v2074_v31 }
  0xe5   :  { %1144 = vmatpush.bf16.msra.mxu2 %v2066_v27 }
  0xe6   :  { %vm392_vm7 = vcmp.gt.f32.partialorder %v352_v59, 0.0  ;;  %v424_v60 = vmul.f32 0.1, %v352_v59 }
  0xe8   :  { %v456_v2 = vsel %vm392_vm7, %v352_v59, %v424_v60  ;;  %v332_v59 = vpop.f32.mrf.mxu3 }
  0xe9   :  { %v486_v4 = vpack.c.bf16 %v456_v2, %v454_v0 }
  0xeb   :  { %v354_v5 = vpop.f32.mrf.mxu1  ;;  %717 = vmatmul.bf16.gmra.mxu2 %v489_v3  ;;  %756 = vmatmul.bf16.vlgmr.msrb.gmra.mxu3 %v486_v4 }
  0xec   :  { %815 = vmatmul.bf16.gmra.mxu0 %v489_v3  ;;  %854 = vmatmul.bf16.vlgmr.msra.gmra.mxu1 %v486_v4  ;;  %v355_v11 = vadd.f32 %v354_v5, %v2442_v50  ;;  %v331_v4 = vadd.f32 %v330_v46, %v2434_v16  ;;  %v333_v5 = vadd.f32 %v332_v59, %v2434_v16 }
  0xee   :  { %v426_v15 = vmul.f32 0.1, %v355_v11  ;;  %vm394_vm10 = vcmp.gt.f32.partialorder %v355_v11, 0.0  ;;  %v445_v10 = vmul.f32 0.1, %v331_v4  ;;  %vm413_vm4 = vcmp.gt.f32.partialorder %v331_v4, 0.0 }
  0xef   :  { %vm415_vm5 = vcmp.gt.f32.partialorder %v333_v5, 0.0 }
  0xf0   :  { %v458_v22 = vsel %vm394_vm10, %v355_v11, %v426_v15  ;;  %v335_v8 = vpop.f32.mrf.mxu3  ;;  %v447_v11 = vmul.f32 0.1, %v333_v5  ;;  %v477_v15 = vsel %vm413_vm4, %v331_v4, %v445_v10 }
  0xf3   :  { %v356_v13 = vpop.f32.mrf.mxu1 }
  0xf4   :  { %v357_v61 = vadd.f32 %v356_v13, %v2442_v50 }
  0xf6   :  { %v428_v19 = vmul.f32 0.1, %v357_v61  ;;  %vm396_vm11 = vcmp.gt.f32.partialorder %v357_v61, 0.0 }
  0xf8   :  { %v460_v23 = vsel %vm396_vm11, %v357_v61, %v428_v19  ;;  %v479_v61 = vsel %vm415_vm5, %v333_v5, %v447_v11  ;;  %v2478_v11 = vperm.slane %v533_v6, 0 }
  0xf9   :  { %v488_v25 = vpack.c.bf16 %v460_v23, %v458_v22  ;;  %v497_v19 = vpack.c.bf16 %v479_v61, %v477_v15  ;;  %v337_v23 = vpop.f32.mrf.mxu3 }
  0xfb   :  { %v359_v26 = vpop.f32.mrf.mxu1  ;;  %722 = vmatmul.bf16.gmra.mxu2 %v491_v24  ;;  %761 = vmatmul.bf16.gmra.mxu3 %v488_v25 }
  0xfc   :  { %820 = vmatmul.bf16.gmra.mxu0 %v491_v24  ;;  %859 = vmatmul.bf16.gmra.mxu1 %v488_v25  ;;  %v360_v32 = vadd.f32 %v359_v26, %v2442_v50  ;;  %v336_v25 = vadd.f32 %v335_v8, %v2434_v16  ;;  %v338_v26 = vadd.f32 %v337_v23, %v2434_v16  ;;  %v2087_v23 = vld [vmem:[#allocation11 + $0x38] sm:$0xff] }
  0xfd   :  { %1361 = vmatpush.bf16.msra.mxu0 %v2087_v23 }
  0xfe   :  { %v430_v35 = vmul.f32 0.1, %v360_v32  ;;  %vm398_vm14 = vcmp.gt.f32.partialorder %v360_v32, 0.0  ;;  %v449_v29 = vmul.f32 0.1, %v336_v25  ;;  %vm417_vm8 = vcmp.gt.f32.partialorder %v336_v25, 0.0 }
  0xff   :  { %v451_v30 = vmul.f32 0.1, %v338_v26  ;;  %vm419_vm9 = vcmp.gt.f32.partialorder %v338_v26, 0.0 }
 0x100   :  { %v462_v41 = vsel %vm398_vm14, %v360_v32, %v430_v35 }
 0x101   :  { %v483_v35 = vsel %vm419_vm9, %v338_v26, %v451_v30 }
 0x103   :  { %v361_v1 = vpop.f32.mrf.mxu1 }
 0x104   :  { %v362_v36 = vadd.f32 %v361_v1, %v2442_v50  ;;  %v481_v1 = vsel %vm417_vm8, %v336_v25, %v449_v29 }
 0x105   :  { %v499_v16 = vpack.c.bf16 %v483_v35, %v481_v1 }
 0x106   :  { %v432_v39 = vmul.f32 0.1, %v362_v36  ;;  %vm400_vm15 = vcmp.gt.f32.partialorder %v362_v36, 0.0 }
 0x108   :  { %v464_v42 = vsel %vm400_vm15, %v362_v36, %v432_v39 }
 0x109   :  { %v490_v43 = vpack.c.bf16 %v464_v42, %v462_v41  ;;  %v2065_v41 = vld [vmem:[#allocation10 + $0x8] sm:$0xff] }
 0x10a   :  { %1145 = vmatpush.bf16.msra.mxu2 %v2065_v41 }
 0x10b   :  { %v364_v45 = vpop.f32.mrf.mxu1  ;;  %766 = vmatmul.bf16.gmra.mxu3 %v490_v43  ;;  %727 = vmatmul.bf16.gmra.mxu2 %v493_v40 }
 0x10c   :  { %864 = vmatmul.bf16.gmra.mxu1 %v490_v43  ;;  %825 = vmatmul.bf16.gmra.mxu0 %v493_v40  ;;  %v365_v52 = vadd.f32 %v364_v45, %v2442_v50  ;;  %v2073_v43 = vld [vmem:[#allocation10 + $0x48] sm:$0xff] }
 0x10d   :  { %1194 = vmatpush.bf16.msra.mxu3 %v2073_v43 }
 0x10e   :  { %v434_v55 = vmul.f32 0.1, %v365_v52  ;;  %vm402_vm2 = vcmp.gt.f32.partialorder %v365_v52, 0.0  ;;  %1146 = vmatpush.bf16.msra.mxu2 %v2064_v57 }
 0x110   :  { %v466_v63 = vsel %vm402_vm2, %v365_v52, %v434_v55 }
 0x113   :  { %v366_v54 = vpop.f32.mrf.mxu1 }
 0x114   :  { %v367_v56 = vadd.f32 %v366_v54, %v2442_v50 }
 0x116   :  { %v436_v60 = vmul.f32 0.1, %v367_v56  ;;  %vm404_vm3 = vcmp.gt.f32.partialorder %v367_v56, 0.0 }
 0x118   :  { %v468_v0 = vsel %vm404_vm3, %v367_v56, %v436_v60  ;;  %v2072_v60 = vld [vmem:[#allocation10 + $0x40] sm:$0xff] }
 0x119   :  { %v492_v2 = vpack.c.bf16 %v468_v0, %v466_v63  ;;  %1195 = vmatpush.bf16.msra.mxu3 %v2072_v60 }
 0x11b   :  { %v369_v3 = vpop.f32.mrf.mxu1  ;;  %771 = vmatmul.bf16.gmra.mxu3 %v492_v2  ;;  %732 = vmatmul.bf16.gmra.mxu2 %v495_v62 }
 0x11c   :  { %869 = vmatmul.bf16.gmra.mxu1 %v492_v2  ;;  %830 = vmatmul.bf16.gmra.mxu0 %v495_v62  ;;  %v370_v9 = vadd.f32 %v369_v3, %v2442_v50 }
 0x11e   :  { %v438_v13 = vmul.f32 0.1, %v370_v9  ;;  %vm406_vm6 = vcmp.gt.f32.partialorder %v370_v9, 0.0 }
 0x120   :  { %v470_v20 = vsel %vm406_vm6, %v370_v9, %v438_v13 }
 0x123   :  { %v371_v12 = vpop.f32.mrf.mxu1 }
 0x124   :  { %v372_v14 = vadd.f32 %v371_v12, %v2442_v50 }
 0x126   :  { %v440_v17 = vmul.f32 0.1, %v372_v14  ;;  %vm408_vm7 = vcmp.gt.f32.partialorder %v372_v14, 0.0 }
 0x128   :  { %v472_v21 = vsel %vm408_vm7, %v372_v14, %v440_v17 }
 0x129   :  { %v494_v22 = vpack.c.bf16 %v472_v21, %v470_v20 }
 0x12b   :  { %v374_v24 = vpop.f32.mrf.mxu1  ;;  %776 = vmatmul.bf16.gmra.mxu3 %v494_v22  ;;  %737 = vmatmul.bf16.gmra.mxu2 %v497_v19 }
 0x12c   :  { %874 = vmatmul.bf16.gmra.mxu1 %v494_v22  ;;  %835 = vmatmul.bf16.gmra.mxu0 %v497_v19  ;;  %v375_v28 = vadd.f32 %v374_v24, %v2442_v50 }
 0x12e   :  { %v442_v33 = vmul.f32 0.1, %v375_v28  ;;  %vm410_vm10 = vcmp.gt.f32.partialorder %v375_v28, 0.0 }
 0x130   :  { %v474_v37 = vsel %vm410_vm10, %v375_v28, %v442_v33 }
 0x133   :  { %v376_v32 = vpop.f32.mrf.mxu1 }
 0x134   :  { %v377_v34 = vadd.f32 %v376_v32, %v2442_v50 }
 0x136   :  { %v444_v36 = vmul.f32 0.1, %v377_v34  ;;  %vm412_vm11 = vcmp.gt.f32.partialorder %v377_v34, 0.0 }
 0x138   :  { %v476_v38 = vsel %vm412_vm11, %v377_v34, %v444_v36 }
 0x139   :  { %v496_v39 = vpack.c.bf16 %v476_v38, %v474_v37 }
 0x13b   :  { %v379_v40 = vpop.f32.mrf.mxu1  ;;  %781 = vmatmul.bf16.gmra.mxu3 %v496_v39  ;;  %742 = vmatmul.bf16.gmra.mxu2 %v499_v16 }
 0x13c   :  { %879 = vmatmul.bf16.gmra.mxu1 %v496_v39  ;;  %840 = vmatmul.bf16.gmra.mxu0 %v499_v16  ;;  %v380_v42 = vadd.f32 %v379_v40, %v2442_v50 }
 0x13e   :  { %v446_v45 = vmul.f32 0.1, %v380_v42  ;;  %vm414_vm12 = vcmp.gt.f32.partialorder %v380_v42, 0.0 }
 0x140   :  { %v478_v48 = vsel %vm414_vm12, %v380_v42, %v446_v45 }
 0x143   :  { %v381_v44 = vpop.f32.mrf.mxu1 }
 0x144   :  { %v382_v46 = vadd.f32 %v381_v44, %v2442_v50 }
 0x146   :  { %v448_v47 = vmul.f32 0.1, %v382_v46  ;;  %vm416_vm13 = vcmp.gt.f32.partialorder %v382_v46, 0.0 }
 0x148   :  { %v480_v49 = vsel %vm416_vm13, %v382_v46, %v448_v47  ;;  %v806_v51 = vpop.f32.mrf.mxu0  ;;  %v2086_v47 = vld [vmem:[#allocation11 + $0x30] sm:$0xff] }
 0x149   :  { %v498_v52 = vpack.c.bf16 %v480_v49, %v478_v48  ;;  %1362 = vmatpush.bf16.msra.mxu0 %v2086_v47 }
 0x14b   :  { %v384_v18 = vpop.f32.mrf.mxu1  ;;  %786 = vmatmul.bf16.gmra.mxu3 %v498_v52 }
 0x14c   :  { %884 = vmatmul.bf16.gmra.mxu1 %v498_v52  ;;  %v385_v54 = vadd.f32 %v384_v18, %v2442_v50 }
 0x14e   :  { %v708_v53 = vpop.f32.mrf.mxu2  ;;  %v450_v58 = vmul.f32 0.1, %v385_v54  ;;  %vm418_vm14 = vcmp.gt.f32.partialorder %v385_v54, 0.0 }
 0x14f   :  { %v709_v15 = vadd.f32 %v708_v53, %v2478_v11 }
 0x150   :  { %v808_v55 = vpop.f32.mrf.mxu0  ;;  %v482_v0 = vsel %vm418_vm14, %v385_v54, %v450_v58 }
 0x153   :  { %v386_v56 = vpop.f32.mrf.mxu1 }
 0x154   :  { %v387_v59 = vadd.f32 %v386_v56, %v2442_v50  ;;  %v2475_v50 = vperm.slane %v533_v6, 1 }
 0x156   :  { %v452_v62 = vmul.f32 0.1, %v387_v59  ;;  %vm420_vm15 = vcmp.gt.f32.partialorder %v387_v59, 0.0  ;;  %v710_v63 = vpop.f32.mrf.mxu2  ;;  %v807_v9 = vadd.f32 %v806_v51, %v2475_v50  ;;  %v809_v14 = vadd.f32 %v808_v55, %v2475_v50 }
 0x157   :  { %v711_v24 = vadd.f32 %v710_v63, %v2478_v11 }
 0x158   :  { %v484_v2 = vsel %vm420_vm15, %v387_v59, %v452_v62  ;;  %v811_v4 = vpop.f32.mrf.mxu0 }
 0x159   :  { %v500_v3 = vpack.c.bf16 %v484_v2, %v482_v0  ;;  %v812_v36 = vadd.f32 %v811_v4, %v2475_v50 }
 0x15b   :  { %791 = vmatmul.bf16.gmra.mxu3 %v500_v3 }
 0x15c   :  { %889 = vmatmul.bf16.gmra.mxu1 %v500_v3 }
 0x15e   :  { %v713_v5 = vpop.f32.mrf.mxu2 }
 0x15f   :  { %v714_v41 = vadd.f32 %v713_v5, %v2478_v11 }
 0x160   :  { %v813_v7 = vpop.f32.mrf.mxu0 }
 0x161   :  { %v814_v39 = vadd.f32 %v813_v7, %v2475_v50 }
 0x166   :  { %v715_v10 = vpop.f32.mrf.mxu2 }
 0x167   :  { %v716_v48 = vadd.f32 %v715_v10, %v2478_v11 }
 0x169   :  { %v855_v8 = vpop.f32.mrf.mxu1  ;;  %v816_v61 = vpop.f32.mrf.mxu0 }
 0x16a   :  { %v856_v12 = vadd.f32 %v855_v8, %v807_v9  ;;  %v817_v62 = vadd.f32 %v816_v61, %v2475_v50 }
 0x16c   :  { %v928_v19 = vmul.f32 0.1, %v856_v12  ;;  %vm896_vm0 = vcmp.gt.f32.partialorder %v856_v12, 0.0 }
 0x16e   :  { %v757_v13 = vpop.f32.mrf.mxu3  ;;  %v960_v25 = vsel %vm896_vm0, %v856_v12, %v928_v19  ;;  %v718_v26 = vpop.f32.mrf.mxu2 }
 0x16f   :  { %v758_v21 = vadd.f32 %v757_v13, %v709_v15  ;;  %v719_v5 = vadd.f32 %v718_v26, %v2478_v11  ;;  %v2085_v13 = vld [vmem:[#allocation11 + $0x28] sm:$0xff] }
 0x170   :  { %1363 = vmatpush.bf16.msra.mxu0 %v2085_v13 }
 0x171   :  { %v857_v17 = vpop.f32.mrf.mxu1  ;;  %v927_v29 = vmul.f32 0.1, %v758_v21  ;;  %vm895_vm2 = vcmp.gt.f32.partialorder %v758_v21, 0.0  ;;  %v818_v1 = vpop.f32.mrf.mxu0 }
 0x172   :  { %v858_v20 = vadd.f32 %v857_v17, %v809_v14  ;;  %v819_v4 = vadd.f32 %v818_v1, %v2475_v50 }
 0x173   :  { %v959_v34 = vsel %vm895_vm2, %v758_v21, %v927_v29 }
 0x174   :  { %vm898_vm1 = vcmp.gt.f32.partialorder %v858_v20, 0.0  ;;  %v930_v22 = vmul.f32 0.1, %v858_v20 }
 0x176   :  { %v962_v27 = vsel %vm898_vm1, %v858_v20, %v930_v22  ;;  %v759_v28 = vpop.f32.mrf.mxu3  ;;  %v720_v40 = vpop.f32.mrf.mxu2 }
 0x177   :  { %v992_v30 = vpack.c.bf16 %v962_v27, %v960_v25  ;;  %v760_v31 = vadd.f32 %v759_v28, %v711_v24  ;;  %v721_v14 = vadd.f32 %v720_v40, %v2478_v11 }
 0x179   :  { %vm897_vm3 = vcmp.gt.f32.partialorder %v760_v31, 0.0  ;;  %v929_v32 = vmul.f32 0.1, %v760_v31  ;;  %v860_v33 = vpop.f32.mrf.mxu1  ;;  %1196 = vmatmul.bf16.vlgmr.msra.gmra.mxu3 %v992_v30  ;;  %v821_v49 = vpop.f32.mrf.mxu0 }
 0x17a   :  { %v861_v37 = vadd.f32 %v860_v33, %v812_v36  ;;  %v822_v27 = vadd.f32 %v821_v49, %v2475_v50 }
 0x17b   :  { %v961_v35 = vsel %vm897_vm3, %v760_v31, %v929_v32 }
 0x17c   :  { %v991_v16 = vpack.c.bf16 %v961_v35, %v959_v34  ;;  %v932_v43 = vmul.f32 0.1, %v861_v37  ;;  %vm900_vm4 = vcmp.gt.f32.partialorder %v861_v37, 0.0 }
 0x17e   :  { %v762_v38 = vpop.f32.mrf.mxu3  ;;  %1147 = vmatmul.bf16.vlgmr.msra.gmra.mxu2 %v991_v16  ;;  %v964_v52 = vsel %vm900_vm4, %v861_v37, %v932_v43  ;;  %v723_v58 = vpop.f32.mrf.mxu2 }
 0x17f   :  { %v763_v45 = vadd.f32 %v762_v38, %v714_v41  ;;  %v724_v33 = vadd.f32 %v723_v58, %v2478_v11  ;;  %v2084_v38 = vld [vmem:[#allocation11 + $0x20] sm:$0xff] }
 0x180   :  { %1364 = vmatpush.bf16.msra.mxu0 %v2084_v38 }
 0x181   :  { %v862_v42 = vpop.f32.mrf.mxu1  ;;  %v931_v53 = vmul.f32 0.1, %v763_v45  ;;  %vm899_vm6 = vcmp.gt.f32.partialorder %v763_v45, 0.0  ;;  %v823_v3 = vpop.f32.mrf.mxu0 }
 0x182   :  { %v863_v44 = vadd.f32 %v862_v42, %v814_v39  ;;  %v824_v32 = vadd.f32 %v823_v3, %v2475_v50 }
 0x183   :  { %v963_v59 = vsel %vm899_vm6, %v763_v45, %v931_v53 }
 0x184   :  { %v934_v46 = vmul.f32 0.1, %v863_v44  ;;  %vm902_vm5 = vcmp.gt.f32.partialorder %v863_v44, 0.0 }
 0x186   :  { %v764_v51 = vpop.f32.mrf.mxu3  ;;  %v966_v18 = vsel %vm902_vm5, %v863_v44, %v934_v46  ;;  %v725_v10 = vpop.f32.mrf.mxu2 }
 0x187   :  { %v765_v54 = vadd.f32 %v764_v51, %v716_v48  ;;  %v994_v55 = vpack.c.bf16 %v966_v18, %v964_v52  ;;  %v726_v39 = vadd.f32 %v725_v10, %v2478_v11 }
 0x189   :  { %v933_v56 = vmul.f32 0.1, %v765_v54  ;;  %v865_v57 = vpop.f32.mrf.mxu1  ;;  %1201 = vmatmul.bf16.gmra.mxu3 %v994_v55  ;;  %vm901_vm7 = vcmp.gt.f32.partialorder %v765_v54, 0.0  ;;  %v826_v20 = vpop.f32.mrf.mxu0 }
 0x18a   :  { %v866_v0 = vadd.f32 %v865_v57, %v817_v62  ;;  %v827_v18 = vadd.f32 %v826_v20, %v2475_v50 }
 0x18b   :  { %v965_v60 = vsel %vm901_vm7, %v765_v54, %v933_v56 }
 0x18c   :  { %v993_v63 = vpack.c.bf16 %v965_v60, %v963_v59  ;;  %v936_v7 = vmul.f32 0.1, %v866_v0  ;;  %vm904_vm8 = vcmp.gt.f32.partialorder %v866_v0, 0.0 }
 0x18e   :  { %v767_v2 = vpop.f32.mrf.mxu3  ;;  %1152 = vmatmul.bf16.gmra.mxu2 %v993_v63  ;;  %v968_v61 = vsel %vm904_vm8, %v866_v0, %v936_v7  ;;  %v728_v28 = vpop.f32.mrf.mxu2 }
 0x18f   :  { %v768_v9 = vadd.f32 %v767_v2, %v719_v5  ;;  %v729_v58 = vadd.f32 %v728_v28, %v2478_v11  ;;  %v2083_v2 = vld [vmem:[#allocation11 + $0x18] sm:$0xff] }
 0x190   :  { %1365 = vmatpush.bf16.msra.mxu0 %v2083_v2 }
 0x191   :  { %v867_v6 = vpop.f32.mrf.mxu1  ;;  %v935_v19 = vmul.f32 0.1, %v768_v9  ;;  %vm903_vm10 = vcmp.gt.f32.partialorder %v768_v9, 0.0  ;;  %v828_v34 = vpop.f32.mrf.mxu0 }
 0x192   :  { %v868_v8 = vadd.f32 %v867_v6, %v819_v4  ;;  %v829_v56 = vadd.f32 %v828_v34, %v2475_v50 }
 0x193   :  { %v967_v25 = vsel %vm903_vm10, %v768_v9, %v935_v19 }
 0x194   :  { %vm906_vm9 = vcmp.gt.f32.partialorder %v868_v8, 0.0  ;;  %v938_v12 = vmul.f32 0.1, %v868_v8 }
 0x196   :  { %v769_v15 = vpop.f32.mrf.mxu3  ;;  %v970_v17 = vsel %vm906_vm9, %v868_v8, %v938_v12  ;;  %v730_v40 = vpop.f32.mrf.mxu2 }
 0x197   :  { %v770_v21 = vadd.f32 %v769_v15, %v721_v14  ;;  %v996_v22 = vpack.c.bf16 %v970_v17, %v968_v61  ;;  %v731_v3 = vadd.f32 %v730_v40, %v2478_v11 }
 0x199   :  { %vm905_vm11 = vcmp.gt.f32.partialorder %v770_v21, 0.0  ;;  %v937_v23 = vmul.f32 0.1, %v770_v21  ;;  %v870_v24 = vpop.f32.mrf.mxu1  ;;  %1206 = vmatmul.bf16.gmra.mxu3 %v996_v22  ;;  %v831_v49 = vpop.f32.mrf.mxu0 }
 0x19a   :  { %v871_v30 = vadd.f32 %v870_v24, %v822_v27  ;;  %v832_v17 = vadd.f32 %v831_v49, %v2475_v50 }
 0x19b   :  { %v969_v26 = vsel %vm905_vm11, %v770_v21, %v937_v23 }
 0x19c   :  { %v995_v29 = vpack.c.bf16 %v969_v26, %v967_v25  ;;  %v940_v35 = vmul.f32 0.1, %v871_v30  ;;  %vm908_vm12 = vcmp.gt.f32.partialorder %v871_v30, 0.0 }
 0x19e   :  { %v772_v31 = vpop.f32.mrf.mxu3  ;;  %1157 = vmatmul.bf16.gmra.mxu2 %v995_v29  ;;  %v972_v42 = vsel %vm908_vm12, %v871_v30, %v940_v35  ;;  %v733_v57 = vpop.f32.mrf.mxu2 }
 0x19f   :  { %v773_v16 = vadd.f32 %v772_v31, %v724_v33  ;;  %v734_v24 = vadd.f32 %v733_v57, %v2478_v11  ;;  %v2082_v31 = vld [vmem:[#allocation11 + $0x10] sm:$0xff] }
 0x1a0   :  { %1366 = vmatpush.bf16.msra.mxu0 %v2082_v31 }
 0x1a1   :  { %v872_v1 = vpop.f32.mrf.mxu1  ;;  %v939_v44 = vmul.f32 0.1, %v773_v16  ;;  %vm907_vm14 = vcmp.gt.f32.partialorder %v773_v16, 0.0  ;;  %v833_v4 = vpop.f32.mrf.mxu0 }
 0x1a2   :  { %v873_v36 = vadd.f32 %v872_v1, %v824_v32  ;;  %v834_v23 = vadd.f32 %v833_v4, %v2475_v50 }
 0x1a3   :  { %v971_v51 = vsel %vm907_vm14, %v773_v16, %v939_v44 }
 0x1a4   :  { %vm910_vm13 = vcmp.gt.f32.partialorder %v873_v36, 0.0  ;;  %v942_v37 = vmul.f32 0.1, %v873_v36 }
 0x1a6   :  { %v774_v41 = vpop.f32.mrf.mxu3  ;;  %v974_v43 = vsel %vm910_vm13, %v873_v36, %v942_v37  ;;  %v735_v14 = vpop.f32.mrf.mxu2 }
 0x1a7   :  { %v775_v45 = vadd.f32 %v774_v41, %v726_v39  ;;  %v998_v46 = vpack.c.bf16 %v974_v43, %v972_v42  ;;  %v736_v32 = vadd.f32 %v735_v14, %v2478_v11 }
 0x1a9   :  { %vm909_vm15 = vcmp.gt.f32.partialorder %v775_v45, 0.0  ;;  %v941_v47 = vmul.f32 0.1, %v775_v45  ;;  %v875_v48 = vpop.f32.mrf.mxu1  ;;  %1211 = vmatmul.bf16.gmra.mxu3 %v998_v46  ;;  %v836_v22 = vpop.f32.mrf.mxu0 }
 0x1aa   :  { %v876_v54 = vadd.f32 %v875_v48, %v827_v18  ;;  %v837_v42 = vadd.f32 %v836_v22, %v2475_v50 }
 0x1ab   :  { %v973_v52 = vsel %vm909_vm15, %v775_v45, %v941_v47  ;;  %v2081_v47 = vld [vmem:[#allocation11 + $0x8] sm:$0xff] }
 0x1ac   :  { %v997_v53 = vpack.c.bf16 %v973_v52, %v971_v51  ;;  %v944_v60 = vmul.f32 0.1, %v876_v54  ;;  %vm912_vm0 = vcmp.gt.f32.partialorder %v876_v54, 0.0  ;;  %1367 = vmatpush.bf16.msra.mxu0 %v2081_v47 }
 0x1ae   :  { %v777_v55 = vpop.f32.mrf.mxu3  ;;  %1162 = vmatmul.bf16.gmra.mxu2 %v997_v53  ;;  %v976_v6 = vsel %vm912_vm0, %v876_v54, %v944_v60  ;;  %v738_v29 = vpop.f32.mrf.mxu2 }
 0x1af   :  { %v778_v63 = vadd.f32 %v777_v55, %v729_v58  ;;  %v739_v49 = vadd.f32 %v738_v29, %v2478_v11 }
 0x1b1   :  { %v877_v59 = vpop.f32.mrf.mxu1  ;;  %v943_v8 = vmul.f32 0.1, %v778_v63  ;;  %vm911_vm2 = vcmp.gt.f32.partialorder %v778_v63, 0.0  ;;  %v838_v37 = vpop.f32.mrf.mxu0 }
 0x1b2   :  { %v878_v62 = vadd.f32 %v877_v59, %v829_v56  ;;  %v839_v48 = vadd.f32 %v838_v37, %v2475_v50 }
 0x1b3   :  { %v975_v15 = vsel %vm911_vm2, %v778_v63, %v943_v8 }
 0x1b4   :  { %vm914_vm1 = vcmp.gt.f32.partialorder %v878_v62, 0.0  ;;  %v946_v0 = vmul.f32 0.1, %v878_v62 }
 0x1b6   :  { %v779_v5 = vpop.f32.mrf.mxu3  ;;  %v978_v7 = vsel %vm914_vm1, %v878_v62, %v946_v0  ;;  %v740_v44 = vpop.f32.mrf.mxu2 }
 0x1b7   :  { %v780_v9 = vadd.f32 %v779_v5, %v731_v3  ;;  %v1000_v10 = vpack.c.bf16 %v978_v7, %v976_v6  ;;  %v741_v56 = vadd.f32 %v740_v44, %v2478_v11 }
 0x1b9   :  { %vm913_vm3 = vcmp.gt.f32.partialorder %v780_v9, 0.0  ;;  %v945_v12 = vmul.f32 0.1, %v780_v9  ;;  %v880_v13 = vpop.f32.mrf.mxu1  ;;  %1216 = vmatmul.bf16.gmra.mxu3 %v1000_v10  ;;  %v841_v53 = vpop.f32.mrf.mxu0 }
 0x1ba   :  { %v881_v20 = vadd.f32 %v880_v13, %v832_v17  ;;  %v842_v6 = vadd.f32 %v841_v53, %v2475_v50 }
 0x1bb   :  { %v977_v61 = vsel %vm913_vm3, %v780_v9, %v945_v12 }
 0x1bc   :  { %v999_v19 = vpack.c.bf16 %v977_v61, %v975_v15  ;;  %v948_v26 = vmul.f32 0.1, %v881_v20  ;;  %vm916_vm4 = vcmp.gt.f32.partialorder %v881_v20, 0.0 }
 0x1be   :  { %v782_v21 = vpop.f32.mrf.mxu3  ;;  %1167 = vmatmul.bf16.gmra.mxu2 %v999_v19  ;;  %v980_v34 = vsel %vm916_vm4, %v881_v20, %v948_v26  ;;  %v743_v0 = vpop.f32.mrf.mxu2 }
 0x1bf   :  { %v783_v28 = vadd.f32 %v782_v21, %v734_v24  ;;  %v744_v13 = vadd.f32 %v743_v0, %v2478_v11 }
 0x1c1   :  { %v882_v25 = vpop.f32.mrf.mxu1  ;;  %v947_v35 = vmul.f32 0.1, %v783_v28  ;;  %vm915_vm6 = vcmp.gt.f32.partialorder %v783_v28, 0.0  ;;  %v843_v8 = vpop.f32.mrf.mxu0 }
 0x1c2   :  { %v883_v27 = vadd.f32 %v882_v25, %v834_v23  ;;  %v844_v12 = vadd.f32 %v843_v8, %v2475_v50  ;;  %v2080_v50 = vld [vmem:[#allocation11] sm:$0xff] }
 0x1c3   :  { %v979_v40 = vsel %vm915_vm6, %v783_v28, %v947_v35  ;;  %1368 = vmatpush.bf16.msra.mxu0 %v2080_v50 }
 0x1c4   :  { %vm918_vm5 = vcmp.gt.f32.partialorder %v883_v27, 0.0  ;;  %v950_v30 = vmul.f32 0.1, %v883_v27 }
 0x1c6   :  { %v784_v33 = vpop.f32.mrf.mxu3  ;;  %v982_v1 = vsel %vm918_vm5, %v883_v27, %v950_v30  ;;  %v745_v15 = vpop.f32.mrf.mxu2 }
 0x1c7   :  { %v785_v36 = vadd.f32 %v784_v33, %v736_v32  ;;  %v1002_v16 = vpack.c.bf16 %v982_v1, %v980_v34  ;;  %v746_v21 = vadd.f32 %v745_v15, %v2478_v11  ;;  %v2514_v11 = vld [vmem:[%s2645_s6] ss:$0 sm:$0xff] }
 0x1c9   :  { %vm917_vm7 = vcmp.gt.f32.partialorder %v785_v36, 0.0  ;;  %v949_v38 = vmul.f32 0.1, %v785_v36  ;;  %v885_v39 = vpop.f32.mrf.mxu1  ;;  %1221 = vmatmul.bf16.gmra.mxu3 %v1002_v16 }
 0x1ca   :  { %v886_v45 = vadd.f32 %v885_v39, %v837_v42 }
 0x1cb   :  { %v981_v41 = vsel %vm917_vm7, %v785_v36, %v949_v38 }
 0x1cc   :  { %v1001_v43 = vpack.c.bf16 %v981_v41, %v979_v40  ;;  %v952_v52 = vmul.f32 0.1, %v886_v45  ;;  %vm920_vm8 = vcmp.gt.f32.partialorder %v886_v45, 0.0 }
 0x1ce   :  { %v787_v46 = vpop.f32.mrf.mxu3  ;;  %1172 = vmatmul.bf16.gmra.mxu2 %v1001_v43  ;;  %v984_v58 = vsel %vm920_vm8, %v886_v45, %v952_v52 }
 0x1cf   :  { %v788_v54 = vadd.f32 %v787_v46, %v739_v49 }
 0x1d1   :  { %v887_v51 = vpop.f32.mrf.mxu1  ;;  %v951_v60 = vmul.f32 0.1, %v788_v54  ;;  %vm919_vm10 = vcmp.gt.f32.partialorder %v788_v54, 0.0 }
 0x1d2   :  { %v888_v18 = vadd.f32 %v887_v51, %v839_v48 }
 0x1d3   :  { %v983_v4 = vsel %vm919_vm10, %v788_v54, %v951_v60 }
 0x1d4   :  { %vm922_vm9 = vcmp.gt.f32.partialorder %v888_v18, 0.0  ;;  %v954_v55 = vmul.f32 0.1, %v888_v18 }
 0x1d6   :  { %v789_v57 = vpop.f32.mrf.mxu3  ;;  %v986_v59 = vsel %vm922_vm9, %v888_v18, %v954_v55 }
 0x1d7   :  { %v790_v62 = vadd.f32 %v789_v57, %v741_v56  ;;  %v1004_v63 = vpack.c.bf16 %v986_v59, %v984_v58 }
 0x1d9   :  { %vm921_vm11 = vcmp.gt.f32.partialorder %v790_v62, 0.0  ;;  %v953_v2 = vmul.f32 0.1, %v790_v62  ;;  %v890_v3 = vpop.f32.mrf.mxu1  ;;  %1226 = vmatmul.bf16.gmra.mxu3 %v1004_v63 }
 0x1da   :  { %v891_v9 = vadd.f32 %v890_v3, %v842_v6 }
 0x1db   :  { %v985_v5 = vsel %vm921_vm11, %v790_v62, %v953_v2 }
 0x1dc   :  { %v1003_v7 = vpack.c.bf16 %v985_v5, %v983_v4  ;;  %v956_v61 = vmul.f32 0.1, %v891_v9  ;;  %vm924_vm12 = vcmp.gt.f32.partialorder %v891_v9, 0.0 }
 0x1de   :  { %v792_v10 = vpop.f32.mrf.mxu3  ;;  %1177 = vmatmul.bf16.gmra.mxu2 %v1003_v7  ;;  %v988_v23 = vsel %vm924_vm12, %v891_v9, %v956_v61 }
 0x1df   :  { %v793_v19 = vadd.f32 %v792_v10, %v744_v13 }
 0x1e1   :  { %v892_v14 = vpop.f32.mrf.mxu1  ;;  %v955_v25 = vmul.f32 0.1, %v793_v19  ;;  %vm923_vm14 = vcmp.gt.f32.partialorder %v793_v19, 0.0 }
 0x1e2   :  { %v893_v17 = vadd.f32 %v892_v14, %v844_v12 }
 0x1e3   :  { %v987_v29 = vsel %vm923_vm14, %v793_v19, %v955_v25 }
 0x1e4   :  { %vm926_vm13 = vcmp.gt.f32.partialorder %v893_v17, 0.0  ;;  %v958_v20 = vmul.f32 0.1, %v893_v17 }
 0x1e6   :  { %v794_v22 = vpop.f32.mrf.mxu3  ;;  %v990_v24 = vsel %vm926_vm13, %v893_v17, %v958_v20 }
 0x1e7   :  { %v795_v26 = vadd.f32 %v794_v22, %v746_v21  ;;  %v1006_v27 = vpack.c.bf16 %v990_v24, %v988_v23 }
 0x1e9   :  { %vm925_vm15 = vcmp.gt.f32.partialorder %v795_v26, 0.0  ;;  %v957_v28 = vmul.f32 0.1, %v795_v26  ;;  %1231 = vmatmul.bf16.gmra.mxu3 %v1006_v27 }
 0x1eb   :  { %v989_v30 = vsel %vm925_vm15, %v795_v26, %v957_v28 }
 0x1ec   :  { %v1005_v31 = vpack.c.bf16 %v989_v30, %v987_v29 }
 0x1ee   :  { %1182 = vmatmul.bf16.gmra.mxu2 %v1005_v31 }
 0x1fc   :  { %v1197_v32 = vpop.f32.mrf.mxu3 }
 0x201   :  { %v1148_v33 = vpop.f32.mrf.mxu2 }
 0x202   :  { %v1149_v34 = vadd.f32 %v2514_v11, %v1148_v33 }
 0x204   :  { %v1199_v1 = vpop.f32.mrf.mxu3  ;;  %v1198_v35 = vadd.f32 %v1197_v32, %v1149_v34 }
 0x206   :  { %v1253_v37 = vmul.f32 0.1, %v1198_v35  ;;  %vm1237_vm0 = vcmp.gt.f32.partialorder %v1198_v35, 0.0 }
 0x208   :  { %v1269_v41 = vsel %vm1237_vm0, %v1198_v35, %v1253_v37 }
 0x209   :  { %v1150_v36 = vpop.f32.mrf.mxu2 }
 0x20a   :  { %v1151_v16 = vadd.f32 %v2514_v11, %v1150_v36 }
 0x20c   :  { %v1200_v38 = vadd.f32 %v1199_v1, %v1151_v16  ;;  %v1202_v39 = vpop.f32.mrf.mxu3 }
 0x20e   :  { %vm1238_vm1 = vcmp.gt.f32.partialorder %v1200_v38, 0.0  ;;  %v1254_v40 = vmul.f32 0.1, %v1200_v38 }
 0x210   :  { %v1270_v42 = vsel %vm1238_vm1, %v1200_v38, %v1254_v40 }
 0x211   :  { %v1153_v43 = vpop.f32.mrf.mxu2  ;;  %v1285_v44 = vpack.c.bf16 %v1270_v42, %v1269_v41 }
 0x212   :  { %v1154_v45 = vadd.f32 %v2514_v11, %v1153_v43 }
 0x213   :  { %1369 = vmatmul.bf16.vlgmr.msra.gmra.mxu0 %v1285_v44 }
 0x214   :  { %v1204_v46 = vpop.f32.mrf.mxu3  ;;  %v1203_v47 = vadd.f32 %v1202_v39, %v1154_v45 }
 0x216   :  { %v1255_v18 = vmul.f32 0.1, %v1203_v47  ;;  %vm1239_vm2 = vcmp.gt.f32.partialorder %v1203_v47, 0.0 }
 0x218   :  { %v1271_v54 = vsel %vm1239_vm2, %v1203_v47, %v1255_v18 }
 0x219   :  { %v1155_v48 = vpop.f32.mrf.mxu2 }
 0x21a   :  { %v1156_v49 = vadd.f32 %v2514_v11, %v1155_v48 }
 0x21c   :  { %v1205_v51 = vadd.f32 %v1204_v46, %v1156_v49  ;;  %v1207_v52 = vpop.f32.mrf.mxu3 }
 0x21e   :  { %vm1240_vm3 = vcmp.gt.f32.partialorder %v1205_v51, 0.0  ;;  %v1256_v53 = vmul.f32 0.1, %v1205_v51 }
 0x220   :  { %v1272_v55 = vsel %vm1240_vm3, %v1205_v51, %v1256_v53 }
 0x221   :  { %v1158_v56 = vpop.f32.mrf.mxu2  ;;  %v1286_v57 = vpack.c.bf16 %v1272_v55, %v1271_v54 }
 0x222   :  { %v1159_v58 = vadd.f32 %v2514_v11, %v1158_v56 }
 0x223   :  { %1374 = vmatmul.bf16.gmra.mxu0 %v1286_v57 }
 0x224   :  { %v1209_v59 = vpop.f32.mrf.mxu3  ;;  %v1208_v60 = vadd.f32 %v1207_v52, %v1159_v58 }
 0x226   :  { %v1257_v0 = vmul.f32 0.1, %v1208_v60  ;;  %vm1241_vm4 = vcmp.gt.f32.partialorder %v1208_v60, 0.0 }
 0x228   :  { %v1273_v5 = vsel %vm1241_vm4, %v1208_v60, %v1257_v0 }
 0x229   :  { %v1160_v62 = vpop.f32.mrf.mxu2 }
 0x22a   :  { %v1161_v63 = vadd.f32 %v2514_v11, %v1160_v62 }
 0x22c   :  { %v1210_v2 = vadd.f32 %v1209_v59, %v1161_v63  ;;  %v1212_v3 = vpop.f32.mrf.mxu3 }
 0x22e   :  { %vm1242_vm5 = vcmp.gt.f32.partialorder %v1210_v2, 0.0  ;;  %v1258_v4 = vmul.f32 0.1, %v1210_v2 }
 0x230   :  { %v1274_v6 = vsel %vm1242_vm5, %v1210_v2, %v1258_v4 }
 0x231   :  { %v1163_v7 = vpop.f32.mrf.mxu2  ;;  %v1287_v8 = vpack.c.bf16 %v1274_v6, %v1273_v5 }
 0x232   :  { %v1164_v9 = vadd.f32 %v2514_v11, %v1163_v7 }
 0x233   :  { %1379 = vmatmul.bf16.gmra.mxu0 %v1287_v8 }
 0x234   :  { %v1214_v10 = vpop.f32.mrf.mxu3  ;;  %v1213_v12 = vadd.f32 %v1212_v3, %v1164_v9  ;;  %v2535_v9 = vld [vmem:[%s2647_s8] ss:$0 sm:$0xff]  ;;  %s2345_s8 = smov [#allocation13]  }
 0x235   :  { %s1670_s1 = sshll.u32 %s2345_s8, 4  ;;  %s1671_s1 = int_to_ptr.vmem [resolvable:$true] %s1670_s1 }
 0x236   :  { %v1259_v15 = vmul.f32 0.1, %v1213_v12  ;;  %vm1243_vm6 = vcmp.gt.f32.partialorder %v1213_v12, 0.0 }
 0x238   :  { %v1275_v20 = vsel %vm1243_vm6, %v1213_v12, %v1259_v15 }
 0x239   :  { %v1165_v13 = vpop.f32.mrf.mxu2 }
 0x23a   :  { %v1166_v14 = vadd.f32 %v2514_v11, %v1165_v13 }
 0x23c   :  { %v1215_v61 = vadd.f32 %v1214_v10, %v1166_v14  ;;  %v1217_v17 = vpop.f32.mrf.mxu3 }
 0x23e   :  { %vm1244_vm7 = vcmp.gt.f32.partialorder %v1215_v61, 0.0  ;;  %v1260_v19 = vmul.f32 0.1, %v1215_v61 }
 0x240   :  { %v1276_v21 = vsel %vm1244_vm7, %v1215_v61, %v1260_v19 }
 0x241   :  { %v1168_v22 = vpop.f32.mrf.mxu2  ;;  %v1288_v23 = vpack.c.bf16 %v1276_v21, %v1275_v20 }
 0x242   :  { %v1169_v24 = vadd.f32 %v2514_v11, %v1168_v22 }
 0x243   :  { %1384 = vmatmul.bf16.gmra.mxu0 %v1288_v23 }
 0x244   :  { %v1219_v25 = vpop.f32.mrf.mxu3  ;;  %v1218_v26 = vadd.f32 %v1217_v17, %v1169_v24 }
 0x246   :  { %v1261_v28 = vmul.f32 0.1, %v1218_v26  ;;  %vm1245_vm8 = vcmp.gt.f32.partialorder %v1218_v26, 0.0 }
 0x248   :  { %v1277_v32 = vsel %vm1245_vm8, %v1218_v26, %v1261_v28 }
 0x249   :  { %v1170_v27 = vpop.f32.mrf.mxu2 }
 0x24a   :  { %v1171_v50 = vadd.f32 %v2514_v11, %v1170_v27 }
 0x24c   :  { %v1220_v29 = vadd.f32 %v1219_v25, %v1171_v50  ;;  %v1222_v30 = vpop.f32.mrf.mxu3 }
 0x24e   :  { %vm1246_vm9 = vcmp.gt.f32.partialorder %v1220_v29, 0.0  ;;  %v1262_v31 = vmul.f32 0.1, %v1220_v29 }
 0x250   :  { %v1278_v33 = vsel %vm1246_vm9, %v1220_v29, %v1262_v31 }
 0x251   :  { %v1173_v34 = vpop.f32.mrf.mxu2  ;;  %v1289_v1 = vpack.c.bf16 %v1278_v33, %v1277_v32 }
 0x252   :  { %v1174_v35 = vadd.f32 %v2514_v11, %v1173_v34 }
 0x253   :  { %1389 = vmatmul.bf16.gmra.mxu0 %v1289_v1 }
 0x254   :  { %v1224_v36 = vpop.f32.mrf.mxu3  ;;  %v1223_v16 = vadd.f32 %v1222_v30, %v1174_v35 }
 0x256   :  { %v1263_v39 = vmul.f32 0.1, %v1223_v16  ;;  %vm1247_vm10 = vcmp.gt.f32.partialorder %v1223_v16, 0.0 }
 0x258   :  { %v1279_v43 = vsel %vm1247_vm10, %v1223_v16, %v1263_v39 }
 0x259   :  { %v1175_v37 = vpop.f32.mrf.mxu2 }
 0x25a   :  { %v1176_v38 = vadd.f32 %v2514_v11, %v1175_v37 }
 0x25c   :  { %v1225_v40 = vadd.f32 %v1224_v36, %v1176_v38  ;;  %v1227_v41 = vpop.f32.mrf.mxu3 }
 0x25e   :  { %vm1248_vm11 = vcmp.gt.f32.partialorder %v1225_v40, 0.0  ;;  %v1264_v42 = vmul.f32 0.1, %v1225_v40 }
 0x260   :  { %v1280_v44 = vsel %vm1248_vm11, %v1225_v40, %v1264_v42 }
 0x261   :  { %v1178_v45 = vpop.f32.mrf.mxu2  ;;  %v1290_v46 = vpack.c.bf16 %v1280_v44, %v1279_v43 }
 0x262   :  { %v1179_v47 = vadd.f32 %v2514_v11, %v1178_v45 }
 0x263   :  { %1394 = vmatmul.bf16.gmra.mxu0 %v1290_v46 }
 0x264   :  { %v1229_v48 = vpop.f32.mrf.mxu3  ;;  %v1228_v49 = vadd.f32 %v1227_v41, %v1179_v47 }
 0x266   :  { %v1265_v18 = vmul.f32 0.1, %v1228_v49  ;;  %vm1249_vm12 = vcmp.gt.f32.partialorder %v1228_v49, 0.0 }
 0x268   :  { %v1281_v55 = vsel %vm1249_vm12, %v1228_v49, %v1265_v18 }
 0x269   :  { %v1180_v51 = vpop.f32.mrf.mxu2 }
 0x26a   :  { %v1181_v52 = vadd.f32 %v2514_v11, %v1180_v51 }
 0x26c   :  { %v1230_v53 = vadd.f32 %v1229_v48, %v1181_v52  ;;  %v1232_v57 = vpop.f32.mrf.mxu3 }
 0x26e   :  { %vm1250_vm13 = vcmp.gt.f32.partialorder %v1230_v53, 0.0  ;;  %v1266_v54 = vmul.f32 0.1, %v1230_v53 }
 0x270   :  { %v1282_v56 = vsel %vm1250_vm13, %v1230_v53, %v1266_v54 }
 0x271   :  { %v1183_v58 = vpop.f32.mrf.mxu2  ;;  %v1291_v59 = vpack.c.bf16 %v1282_v56, %v1281_v55 }
 0x272   :  { %v1184_v60 = vadd.f32 %v2514_v11, %v1183_v58 }
 0x273   :  { %1399 = vmatmul.bf16.gmra.mxu0 %v1291_v59 }
 0x274   :  { %v1233_v62 = vadd.f32 %v1232_v57, %v1184_v60  ;;  %v1234_v2 = vpop.f32.mrf.mxu3 }
 0x276   :  { %v1267_v3 = vmul.f32 0.1, %v1233_v62  ;;  %vm1251_vm14 = vcmp.gt.f32.partialorder %v1233_v62, 0.0 }
 0x278   :  { %v1283_v6 = vsel %vm1251_vm14, %v1233_v62, %v1267_v3 }
 0x279   :  { %v1185_v63 = vpop.f32.mrf.mxu2 }
 0x27a   :  { %v1186_v0 = vadd.f32 %v2514_v11, %v1185_v63 }
 0x27c   :  { %v1235_v4 = vadd.f32 %v1234_v2, %v1186_v0 }
 0x27e   :  { %vm1252_vm15 = vcmp.gt.f32.partialorder %v1235_v4, 0.0  ;;  %v1268_v5 = vmul.f32 0.1, %v1235_v4 }
 0x280   :  { %v1284_v7 = vsel %vm1252_vm15, %v1235_v4, %v1268_v5 }
 0x281   :  { %v1292_v8 = vpack.c.bf16 %v1284_v7, %v1283_v6 }
 0x283   :  { %1404 = vmatmul.bf16.gmra.mxu0 %v1292_v8 }
 0x290   :  { %v1370_v10 = vpop.f32.mrf.mxu0 }
 0x291   :  { %v2538_v12 = vadd.f32 %v2535_v9, %v1370_v10 }
 0x293   :  { %v1410_v11 = vmul.f32 %v2538_v12, %v2538_v12 }
 0x295   :  { %1426 = vadd.xlane.f32.xlu0 %v1410_v11 }
 0x298   :  { %v1372_v13 = vpop.f32.mrf.mxu0 }
 0x299   :  { %v2543_v14 = vadd.f32 %v2535_v9, %v1372_v13 }
 0x29b   :  { %v1411_v15 = vmul.f32 %v2543_v14, %v2543_v14 }
 0x29d   :  { %1428 = vadd.xlane.f32.xlu0 %v1411_v15 }
 0x2a0   :  { %v1375_v61 = vpop.f32.mrf.mxu0 }
 0x2a1   :  { %v2548_v17 = vadd.f32 %v2535_v9, %v1375_v61 }
 0x2a3   :  { %v1412_v19 = vmul.f32 %v2548_v17, %v2548_v17 }
 0x2a5   :  { %1430 = vadd.xlane.f32.xlu1 %v1412_v19 }
 0x2a8   :  { %v1377_v20 = vpop.f32.mrf.mxu0 }
 0x2a9   :  { %v2553_v21 = vadd.f32 %v2535_v9, %v1377_v20 }
 0x2ab   :  { %v1413_v22 = vmul.f32 %v2553_v21, %v2553_v21 }
 0x2ad   :  { %1432 = vadd.xlane.f32.xlu1 %v1413_v22 }
 0x2b0   :  { %v1380_v23 = vpop.f32.mrf.mxu0 }
 0x2b1   :  { %v2558_v24 = vadd.f32 %v2535_v9, %v1380_v23 }
 0x2b3   :  { %v1414_v25 = vmul.f32 %v2558_v24, %v2558_v24 }
 0x2b5   :  { %1434 = vadd.xlane.f32.xlu2 %v1414_v25 }
 0x2b8   :  { %v1382_v26 = vpop.f32.mrf.mxu0 }
 0x2b9   :  { %v2563_v27 = vadd.f32 %v2535_v9, %v1382_v26 }
 0x2bb   :  { %v1415_v50 = vmul.f32 %v2563_v27, %v2563_v27 }
 0x2bd   :  { %1436 = vadd.xlane.f32.xlu2 %v1415_v50 }
 0x2c0   :  { %v1385_v28 = vpop.f32.mrf.mxu0 }
 0x2c1   :  { %v2568_v29 = vadd.f32 %v2535_v9, %v1385_v28 }
 0x2c3   :  { %v1416_v30 = vmul.f32 %v2568_v29, %v2568_v29 }
 0x2c5   :  { %1438 = vadd.xlane.f32.xlu0 %v1416_v30 }
 0x2c8   :  { %v1387_v31 = vpop.f32.mrf.mxu0 }
 0x2c9   :  { %v2573_v32 = vadd.f32 %v2535_v9, %v1387_v31 }
 0x2cb   :  { %v1417_v33 = vmul.f32 %v2573_v32, %v2573_v32 }
 0x2cd   :  { %1440 = vadd.xlane.f32.xlu1 %v1417_v33 }
 0x2d0   :  { %v1390_v34 = vpop.f32.mrf.mxu0 }
 0x2d1   :  { %v2578_v1 = vadd.f32 %v2535_v9, %v1390_v34 }
 0x2d3   :  { %v1418_v35 = vmul.f32 %v2578_v1, %v2578_v1 }
 0x2d5   :  { %1442 = vadd.xlane.f32.xlu2 %v1418_v35 }
 0x2d8   :  { %v1392_v36 = vpop.f32.mrf.mxu0 }
 0x2d9   :  { %v2583_v16 = vadd.f32 %v2535_v9, %v1392_v36 }
 0x2db   :  { %v1419_v37 = vmul.f32 %v2583_v16, %v2583_v16 }
 0x2dd   :  { %1444 = vadd.xlane.f32.xlu0 %v1419_v37 }
 0x2e0   :  { %v1395_v38 = vpop.f32.mrf.mxu0 }
 0x2e1   :  { %v2588_v39 = vadd.f32 %v2535_v9, %v1395_v38 }
 0x2e3   :  { %v1420_v40 = vmul.f32 %v2588_v39, %v2588_v39 }
 0x2e5   :  { %1446 = vadd.xlane.f32.xlu1 %v1420_v40 }
 0x2e8   :  { %v1397_v41 = vpop.f32.mrf.mxu0 }
 0x2e9   :  { %v2593_v42 = vadd.f32 %v2535_v9, %v1397_v41 }
 0x2eb   :  { %v1421_v43 = vmul.f32 %v2593_v42, %v2593_v42 }
 0x2ed   :  { %1448 = vadd.xlane.f32.xlu2 %v1421_v43 }
 0x2f0   :  { %v1400_v44 = vpop.f32.mrf.mxu0 }
 0x2f1   :  { %v2598_v45 = vadd.f32 %v2535_v9, %v1400_v44 }
 0x2f3   :  { %v1422_v46 = vmul.f32 %v2598_v45, %v2598_v45 }
 0x2f5   :  { %1450 = vadd.xlane.f32.xlu0 %v1422_v46 }
 0x2f8   :  { %v1402_v47 = vpop.f32.mrf.mxu0 }
 0x2f9   :  { %v2603_v48 = vadd.f32 %v2535_v9, %v1402_v47 }
 0x2fb   :  { %v1423_v49 = vmul.f32 %v2603_v48, %v2603_v48 }
 0x2fd   :  { %1452 = vadd.xlane.f32.xlu1 %v1423_v49 }
 0x300   :  { %v1405_v51 = vpop.f32.mrf.mxu0 }
 0x301   :  { %v2608_v52 = vadd.f32 %v2535_v9, %v1405_v51 }
 0x303   :  { %v1424_v18 = vmul.f32 %v2608_v52, %v2608_v52 }
 0x305   :  { %1454 = vadd.xlane.f32.xlu2 %v1424_v18 }
 0x308   :  { %v1407_v53 = vpop.f32.mrf.mxu0  ;;  %v1427_v54 = vpop.xlane.xlu0 %1426 }
 0x309   :  { %v2613_v55 = vadd.f32 %v2535_v9, %v1407_v53  ;;  %v1458_v56 = vmax.f32 %v1427_v54, 1e-24 }
 0x30b   :  { %2125 = vrsqrt.f32 %v1458_v56  ;;  %v1425_v57 = vmul.f32 %v2613_v55, %v2613_v55  ;;  %vm1480_vm1 = vweird.f32 %v1458_v56 }
 0x30d   :  { %1456 = vadd.xlane.f32.xlu0 %v1425_v57 }
 0x310   :  { %v1429_v58 = vpop.xlane.xlu0 %1428 }
 0x311   :  { %v2126_v59 = vpop.eup %2125  ;;  %v1459_v60 = vmax.f32 %v1429_v58, 1e-24 }
 0x312   :  { %v1475_v62 = vmul.f32 %v2126_v59, %v1458_v56  ;;  %vm1481_vm0 = vweird.f32 %v2126_v59 }
 0x313   :  { %2127 = vrsqrt.f32 %v1459_v60  ;;  %vm1482_vm2 = vmor %vm1480_vm1, %vm1481_vm0  ;;  %vm1490_vm4 = vweird.f32 %v1459_v60 }
 0x314   :  { %v1476_v63 = vmul.f32 %v2126_v59, %v1475_v62 }
 0x316   :  { %v1477_v0 = vmul.f32 0.5, %v1476_v63 }
 0x318   :  { %v1478_v2 = vsub.f32 1.5, %v1477_v0  ;;  %v1431_v3 = vpop.xlane.xlu1 %1430 }
 0x319   :  { %v2128_v4 = vpop.eup %2127  ;;  %v1460_v5 = vmax.f32 %v1431_v3, 1e-24 }
 0x31a   :  { %v1479_v6 = vmul.f32 %v2126_v59, %v1478_v2  ;;  %v1485_v7 = vmul.f32 %v2128_v4, %v1459_v60  ;;  %vm1491_vm3 = vweird.f32 %v2128_v4 }
 0x31b   :  { %2129 = vrsqrt.f32 %v1460_v5  ;;  %vm1492_vm5 = vmor %vm1490_vm4, %vm1491_vm3  ;;  %vm1500_vm7 = vweird.f32 %v1460_v5 }
 0x31c   :  { %v1483_v8 = vsel %vm1482_vm2, %v2126_v59, %v1479_v6  ;;  %v1486_v9 = vmul.f32 %v2128_v4, %v1485_v7 }
 0x31d   :  { %v1634_v10 = vmul.f32 %v1483_v8, %v2538_v12 }
 0x31e   :  { %v1487_v11 = vmul.f32 0.5, %v1486_v9 }
 0x31f   :  { %1650 = vst [vmem:[#allocation13] sm:$0xff] %v1634_v10 }
 0x320   :  { %v1488_v13 = vsub.f32 1.5, %v1487_v11  ;;  %v1433_v15 = vpop.xlane.xlu1 %1432 }
 0x321   :  { %v2130_v61 = vpop.eup %2129  ;;  %v1461_v19 = vmax.f32 %v1433_v15, 1e-24 }
 0x322   :  { %v1489_v20 = vmul.f32 %v2128_v4, %v1488_v13  ;;  %v1495_v22 = vmul.f32 %v2130_v61, %v1460_v5  ;;  %vm1501_vm6 = vweird.f32 %v2130_v61 }
 0x323   :  { %2131 = vrsqrt.f32 %v1461_v19  ;;  %vm1502_vm8 = vmor %vm1500_vm7, %vm1501_vm6  ;;  %vm1510_vm10 = vweird.f32 %v1461_v19 }
 0x324   :  { %v1493_v23 = vsel %vm1492_vm5, %v2128_v4, %v1489_v20  ;;  %v1496_v25 = vmul.f32 %v2130_v61, %v1495_v22 }
 0x325   :  { %v1635_v26 = vmul.f32 %v1493_v23, %v2543_v14 }
 0x326   :  { %v1497_v50 = vmul.f32 0.5, %v1496_v25 }
 0x327   :  { %1651 = vst [vmem:[#allocation13 + $0x8] sm:$0xff] %v1635_v26 }
 0x328   :  { %v1498_v28 = vsub.f32 1.5, %v1497_v50  ;;  %v1435_v12 = vpop.xlane.xlu2 %1434 }
 0x329   :  { %v2132_v30 = vpop.eup %2131  ;;  %v1462_v31 = vmax.f32 %v1435_v12, 1e-24 }
 0x32a   :  { %v1499_v33 = vmul.f32 %v2130_v61, %v1498_v28  ;;  %v1505_v34 = vmul.f32 %v2132_v30, %v1461_v19  ;;  %vm1511_vm9 = vweird.f32 %v2132_v30 }
 0x32b   :  { %2133 = vrsqrt.f32 %v1462_v31  ;;  %vm1512_vm11 = vmor %vm1510_vm10, %vm1511_vm9  ;;  %vm1520_vm13 = vweird.f32 %v1462_v31 }
 0x32c   :  { %v1503_v35 = vsel %vm1502_vm8, %v2130_v61, %v1499_v33  ;;  %v1506_v36 = vmul.f32 %v2132_v30, %v1505_v34 }
 0x32d   :  { %v1636_v37 = vmul.f32 %v1503_v35, %v2548_v17 }
 0x32e   :  { %v1507_v38 = vmul.f32 0.5, %v1506_v36 }
 0x32f   :  { %1652 = vst [vmem:[#allocation13 + $0x10] sm:$0xff] %v1636_v37 }
 0x330   :  { %v1508_v40 = vsub.f32 1.5, %v1507_v38  ;;  %v1437_v14 = vpop.xlane.xlu2 %1436 }
 0x331   :  { %v2134_v41 = vpop.eup %2133  ;;  %v1463_v43 = vmax.f32 %v1437_v14, 1e-24 }
 0x332   :  { %v1509_v44 = vmul.f32 %v2132_v30, %v1508_v40  ;;  %v1515_v46 = vmul.f32 %v2134_v41, %v1462_v31  ;;  %vm1521_vm12 = vweird.f32 %v2134_v41 }
 0x333   :  { %2135 = vrsqrt.f32 %v1463_v43  ;;  %vm1522_vm14 = vmor %vm1520_vm13, %vm1521_vm12  ;;  %vm1530_vm0 = vweird.f32 %v1463_v43 }
 0x334   :  { %v1513_v47 = vsel %vm1512_vm11, %v2132_v30, %v1509_v44  ;;  %v1516_v49 = vmul.f32 %v2134_v41, %v1515_v46 }
 0x335   :  { %v1637_v51 = vmul.f32 %v1513_v47, %v2553_v21 }
 0x336   :  { %v1517_v18 = vmul.f32 0.5, %v1516_v49 }
 0x337   :  { %1653 = vst [vmem:[#allocation13 + $0x18] sm:$0xff] %v1637_v51 }
 0x338   :  { %v1518_v53 = vsub.f32 1.5, %v1517_v18  ;;  %v1439_v17 = vpop.xlane.xlu0 %1438 }
 0x339   :  { %v2136_v54 = vpop.eup %2135  ;;  %v1464_v56 = vmax.f32 %v1439_v17, 1e-24 }
 0x33a   :  { %v1519_v57 = vmul.f32 %v2134_v41, %v1518_v53  ;;  %v1525_v58 = vmul.f32 %v2136_v54, %v1463_v43  ;;  %vm1531_vm15 = vweird.f32 %v2136_v54 }
 0x33b   :  { %2137 = vrsqrt.f32 %v1464_v56  ;;  %vm1532_vm1 = vmor %vm1530_vm0, %vm1531_vm15  ;;  %vm1540_vm3 = vweird.f32 %v1464_v56 }
 0x33c   :  { %v1523_v59 = vsel %vm1522_vm14, %v2134_v41, %v1519_v57  ;;  %v1526_v60 = vmul.f32 %v2136_v54, %v1525_v58 }
 0x33d   :  { %v1638_v62 = vmul.f32 %v1523_v59, %v2558_v24 }
 0x33e   :  { %v1527_v63 = vmul.f32 0.5, %v1526_v60 }
 0x33f   :  { %1654 = vst [vmem:[#allocation13 + $0x20] sm:$0xff] %v1638_v62 }
 0x340   :  { %v1528_v0 = vsub.f32 1.5, %v1527_v63  ;;  %v1441_v21 = vpop.xlane.xlu1 %1440 }
 0x341   :  { %v2138_v2 = vpop.eup %2137  ;;  %v1465_v3 = vmax.f32 %v1441_v21, 1e-24 }
 0x342   :  { %v1529_v4 = vmul.f32 %v2136_v54, %v1528_v0  ;;  %v1535_v5 = vmul.f32 %v2138_v2, %v1464_v56  ;;  %vm1541_vm2 = vweird.f32 %v2138_v2 }
 0x343   :  { %2139 = vrsqrt.f32 %v1465_v3  ;;  %vm1542_vm4 = vmor %vm1540_vm3, %vm1541_vm2  ;;  %vm1550_vm6 = vweird.f32 %v1465_v3 }
 0x344   :  { %v1533_v6 = vsel %vm1532_vm1, %v2136_v54, %v1529_v4  ;;  %v1536_v7 = vmul.f32 %v2138_v2, %v1535_v5 }
 0x345   :  { %v1639_v8 = vmul.f32 %v1533_v6, %v2563_v27 }
 0x346   :  { %v1537_v9 = vmul.f32 0.5, %v1536_v7 }
 0x347   :  { %1655 = vst [vmem:[#allocation13 + $0x28] sm:$0xff] %v1639_v8 }
 0x348   :  { %v1538_v10 = vsub.f32 1.5, %v1537_v9  ;;  %v1443_v24 = vpop.xlane.xlu2 %1442 }
 0x349   :  { %v2140_v11 = vpop.eup %2139  ;;  %v1466_v13 = vmax.f32 %v1443_v24, 1e-24 }
 0x34a   :  { %v1539_v15 = vmul.f32 %v2138_v2, %v1538_v10  ;;  %v1545_v61 = vmul.f32 %v2140_v11, %v1465_v3  ;;  %vm1551_vm5 = vweird.f32 %v2140_v11 }
 0x34b   :  { %2141 = vrsqrt.f32 %v1466_v13  ;;  %vm1552_vm7 = vmor %vm1550_vm6, %vm1551_vm5  ;;  %vm1560_vm9 = vweird.f32 %v1466_v13 }
 0x34c   :  { %v1543_v19 = vsel %vm1542_vm4, %v2138_v2, %v1539_v15  ;;  %v1546_v20 = vmul.f32 %v2140_v11, %v1545_v61 }
 0x34d   :  { %v1640_v22 = vmul.f32 %v1543_v19, %v2568_v29 }
 0x34e   :  { %v1547_v23 = vmul.f32 0.5, %v1546_v20 }
 0x34f   :  { %1656 = vst [vmem:[#allocation13 + $0x30] sm:$0xff] %v1640_v22 }
 0x350   :  { %v1548_v25 = vsub.f32 1.5, %v1547_v23  ;;  %v1445_v27 = vpop.xlane.xlu0 %1444 }
 0x351   :  { %v2142_v26 = vpop.eup %2141  ;;  %v1467_v50 = vmax.f32 %v1445_v27, 1e-24 }
 0x352   :  { %v1549_v28 = vmul.f32 %v2140_v11, %v1548_v25  ;;  %v1555_v12 = vmul.f32 %v2142_v26, %v1466_v13  ;;  %vm1561_vm8 = vweird.f32 %v2142_v26 }
 0x353   :  { %2143 = vrsqrt.f32 %v1467_v50  ;;  %vm1562_vm10 = vmor %vm1560_vm9, %vm1561_vm8  ;;  %vm1570_vm12 = vweird.f32 %v1467_v50 }
 0x354   :  { %v1553_v30 = vsel %vm1552_vm7, %v2140_v11, %v1549_v28  ;;  %v1556_v31 = vmul.f32 %v2142_v26, %v1555_v12 }
 0x355   :  { %v1641_v33 = vmul.f32 %v1553_v30, %v2573_v32 }
 0x356   :  { %v1557_v34 = vmul.f32 0.5, %v1556_v31 }
 0x357   :  { %1657 = vst [vmem:[#allocation13 + $0x38] sm:$0xff] %v1641_v33 }
 0x358   :  { %v1558_v35 = vsub.f32 1.5, %v1557_v34  ;;  %v1447_v29 = vpop.xlane.xlu1 %1446 }
 0x359   :  { %v2144_v36 = vpop.eup %2143  ;;  %v1468_v37 = vmax.f32 %v1447_v29, 1e-24 }
 0x35a   :  { %v1559_v38 = vmul.f32 %v2142_v26, %v1558_v35  ;;  %v1565_v40 = vmul.f32 %v2144_v36, %v1467_v50  ;;  %vm1571_vm11 = vweird.f32 %v2144_v36 }
 0x35b   :  { %2145 = vrsqrt.f32 %v1468_v37  ;;  %vm1572_vm13 = vmor %vm1570_vm12, %vm1571_vm11  ;;  %vm1580_vm15 = vweird.f32 %v1468_v37 }
 0x35c   :  { %v1563_v14 = vsel %vm1562_vm10, %v2142_v26, %v1559_v38  ;;  %v1566_v41 = vmul.f32 %v2144_v36, %v1565_v40 }
 0x35d   :  { %v1642_v43 = vmul.f32 %v1563_v14, %v2578_v1 }
 0x35e   :  { %v1567_v44 = vmul.f32 0.5, %v1566_v41 }
 0x35f   :  { %1658 = vst [vmem:[#allocation13 + $0x40] sm:$0xff] %v1642_v43 }
 0x360   :  { %v1568_v46 = vsub.f32 1.5, %v1567_v44  ;;  %v1449_v32 = vpop.xlane.xlu2 %1448 }
 0x361   :  { %v2146_v47 = vpop.eup %2145  ;;  %v1469_v49 = vmax.f32 %v1449_v32, 1e-24 }
 0x362   :  { %v1569_v51 = vmul.f32 %v2144_v36, %v1568_v46  ;;  %v1575_v18 = vmul.f32 %v2146_v47, %v1468_v37  ;;  %vm1581_vm14 = vweird.f32 %v2146_v47 }
 0x363   :  { %2147 = vrsqrt.f32 %v1469_v49  ;;  %vm1582_vm0 = vmor %vm1580_vm15, %vm1581_vm14  ;;  %vm1590_vm2 = vweird.f32 %v1469_v49 }
 0x364   :  { %v1573_v53 = vsel %vm1572_vm13, %v2144_v36, %v1569_v51  ;;  %v1576_v17 = vmul.f32 %v2146_v47, %v1575_v18 }
 0x365   :  { %v1643_v54 = vmul.f32 %v1573_v53, %v2583_v16 }
 0x366   :  { %v1577_v56 = vmul.f32 0.5, %v1576_v17 }
 0x367   :  { %1659 = vst [vmem:[#allocation13 + $0x48] sm:$0xff] %v1643_v54 }
 0x368   :  { %v1578_v57 = vsub.f32 1.5, %v1577_v56  ;;  %v1451_v1 = vpop.xlane.xlu0 %1450 }
 0x369   :  { %v2148_v58 = vpop.eup %2147  ;;  %v1470_v59 = vmax.f32 %v1451_v1, 1e-24 }
 0x36a   :  { %v1579_v60 = vmul.f32 %v2146_v47, %v1578_v57  ;;  %v1585_v62 = vmul.f32 %v2148_v58, %v1469_v49  ;;  %vm1591_vm1 = vweird.f32 %v2148_v58 }
 0x36b   :  { %2149 = vrsqrt.f32 %v1470_v59  ;;  %vm1592_vm3 = vmor %vm1590_vm2, %vm1591_vm1  ;;  %vm1600_vm5 = vweird.f32 %v1470_v59 }
 0x36c   :  { %v1583_v63 = vsel %vm1582_vm0, %v2146_v47, %v1579_v60  ;;  %v1586_v0 = vmul.f32 %v2148_v58, %v1585_v62 }
 0x36d   :  { %v1644_v21 = vmul.f32 %v1583_v63, %v2588_v39 }
 0x36e   :  { %v1587_v2 = vmul.f32 0.5, %v1586_v0 }
 0x36f   :  { %1660 = vst [vmem:[#allocation13 + $0x50] sm:$0xff] %v1644_v21 }
 0x370   :  { %v1588_v3 = vsub.f32 1.5, %v1587_v2  ;;  %v1453_v16 = vpop.xlane.xlu1 %1452 }
 0x371   :  { %v2150_v4 = vpop.eup %2149  ;;  %v1471_v5 = vmax.f32 %v1453_v16, 1e-24 }
 0x372   :  { %v1589_v6 = vmul.f32 %v2148_v58, %v1588_v3  ;;  %v1595_v7 = vmul.f32 %v2150_v4, %v1470_v59  ;;  %vm1601_vm4 = vweird.f32 %v2150_v4 }
 0x373   :  { %2151 = vrsqrt.f32 %v1471_v5  ;;  %vm1602_vm6 = vmor %vm1600_vm5, %vm1601_vm4  ;;  %vm1610_vm8 = vweird.f32 %v1471_v5 }
 0x374   :  { %v1593_v8 = vsel %vm1592_vm3, %v2148_v58, %v1589_v6  ;;  %v1596_v9 = vmul.f32 %v2150_v4, %v1595_v7 }
 0x375   :  { %v1645_v10 = vmul.f32 %v1593_v8, %v2593_v42 }
 0x376   :  { %v1597_v24 = vmul.f32 0.5, %v1596_v9 }
 0x377   :  { %1661 = vst [vmem:[#allocation13 + $0x58] sm:$0xff] %v1645_v10 }
 0x378   :  { %v1598_v11 = vsub.f32 1.5, %v1597_v24  ;;  %v1455_v39 = vpop.xlane.xlu2 %1454 }
 0x379   :  { %v2152_v13 = vpop.eup %2151  ;;  %v1472_v15 = vmax.f32 %v1455_v39, 1e-24 }
 0x37a   :  { %v1599_v61 = vmul.f32 %v2150_v4, %v1598_v11  ;;  %v1605_v19 = vmul.f32 %v2152_v13, %v1471_v5  ;;  %vm1611_vm7 = vweird.f32 %v2152_v13 }
 0x37b   :  { %2153 = vrsqrt.f32 %v1472_v15  ;;  %vm1612_vm9 = vmor %vm1610_vm8, %vm1611_vm7  ;;  %vm1620_vm11 = vweird.f32 %v1472_v15 }
 0x37c   :  { %v1603_v20 = vsel %vm1602_vm6, %v2150_v4, %v1599_v61  ;;  %v1606_v22 = vmul.f32 %v2152_v13, %v1605_v19 }
 0x37d   :  { %v1646_v23 = vmul.f32 %v1603_v20, %v2598_v45 }
 0x37e   :  { %v1607_v25 = vmul.f32 0.5, %v1606_v22 }
 0x37f   :  { %1662 = vst [vmem:[#allocation13 + $0x60] sm:$0xff] %v1646_v23 }
 0x380   :  { %v1608_v27 = vsub.f32 1.5, %v1607_v25  ;;  %v1457_v42 = vpop.xlane.xlu0 %1456 }
 0x381   :  { %v2154_v26 = vpop.eup %2153  ;;  %v1473_v50 = vmax.f32 %v1457_v42, 1e-24 }
 0x382   :  { %v1609_v28 = vmul.f32 %v2152_v13, %v1608_v27  ;;  %v1615_v12 = vmul.f32 %v2154_v26, %v1472_v15  ;;  %vm1621_vm10 = vweird.f32 %v2154_v26 }
 0x383   :  { %2155 = vrsqrt.f32 %v1473_v50  ;;  %vm1622_vm12 = vmor %vm1620_vm11, %vm1621_vm10  ;;  %vm1630_vm14 = vweird.f32 %v1473_v50 }
 0x384   :  { %v1613_v30 = vsel %vm1612_vm9, %v2152_v13, %v1609_v28  ;;  %v1616_v31 = vmul.f32 %v2154_v26, %v1615_v12 }
 0x385   :  { %v1647_v33 = vmul.f32 %v1613_v30, %v2603_v48 }
 0x386   :  { %v1617_v34 = vmul.f32 0.5, %v1616_v31 }
 0x387   :  { %1663 = vst [vmem:[#allocation13 + $0x68] sm:$0xff] %v1647_v33 }
 0x388   :  { %v1618_v35 = vsub.f32 1.5, %v1617_v34 }
 0x389   :  { %v2156_v45 = vpop.eup %2155 }
 0x38a   :  { %v1619_v29 = vmul.f32 %v2154_v26, %v1618_v35  ;;  %v1625_v36 = vmul.f32 %v2156_v45, %v1473_v50  ;;  %vm1631_vm13 = vweird.f32 %v2156_v45 }
 0x38b   :  { %vm1632_vm15 = vmor %vm1630_vm14, %vm1631_vm13 }
 0x38c   :  { %v1623_v37 = vsel %vm1622_vm12, %v2154_v26, %v1619_v29  ;;  %v1626_v38 = vmul.f32 %v2156_v45, %v1625_v36 }
 0x38d   :  { %v1648_v40 = vmul.f32 %v1623_v37, %v2608_v52 }
 0x38e   :  { %v1627_v14 = vmul.f32 0.5, %v1626_v38 }
 0x38f   :  { %1664 = vst [vmem:[#allocation13 + $0x70] sm:$0xff] %v1648_v40 }
 0x390   :  { %v1628_v41 = vsub.f32 1.5, %v1627_v14 }
 0x392   :  { %v1629_v43 = vmul.f32 %v2156_v45, %v1628_v41 }
 0x394   :  { %v1633_v48 = vsel %vm1632_vm15, %v2156_v45, %v1629_v43 }
 0x395   :  { %v1649_v44 = vmul.f32 %v1633_v48, %v2613_v55 }
 0x397   :  { %1665 = vst [vmem:[#allocation13 + $0x78] sm:$0xff] %v1649_v44 }
 0x398   :  { %1678 = dma.vmem_to_hbm [thread:$0]  %s1671_s1, 2048, %s1673_s23, [#allocation4], %s2336_s17, %s2336_s17, %s2337_s18  }
 0x399   :  { %2333 = dma.done.wait [#allocation4], 2048  }
 0x39a   :  { %2334 = vsyncadd [#allocation4], 4294965248 }
 0x39b   :  { %1683 = vsyncpa [#allocation3], 1 }
 0x39c   :  { %1684 = vsyncpa [#allocation6], 1 }
 0x39d   :  { %1685 = vsyncpa [#allocation9], 1 }
 0x39e   :  { %1686 = vsyncpa [#allocation12], 1 }
 0x39f   :  { %1687 = vsyncpa [#allocation4], 1 }

</bundles_post_ra>
